<compile_context>
chip_gen: v7x
topology: tpu7x:2x2x1
jax: 0.10.0
libtpu: 0.0.40
codegen_flags: <defaults>
</compile_context>

<pallas_src>
import functools

import jax
import jax.numpy as jnp
from jax.experimental import pallas as pl
from jax.experimental.pallas import tpu as pltpu


# --------------------------------------------------------------------------- #
# Tiling / VMEM helpers
# --------------------------------------------------------------------------- #
def _round_up(x, m):
    return ((x + m - 1) // m) * m


def _vmem_capacity_bytes():
    """Physical VMEM per TensorCore (128 MiB v5e/v6e, 64 MiB v7x)."""
    try:
        return int(pltpu.get_tpu_info().vmem_capacity_bytes)
    except Exception:
        return 64 * 1024 * 1024  # conservative fallback (v7x per-TC VMEM)


def _vmem_need_bytes(tm, ti, H, x_isz, w_isz, out_isz):
    return (2 * tm * H * x_isz            # x tiles (double-buffered)
            + 2 * H * (2 * ti) * w_isz    # fused [gate|up] weight chunks
            + 2 * ti * H * w_isz          # down-proj weight chunks
            + 2 * tm * H * out_isz        # output tiles
            + tm * H * 4                  # f32 accumulator scratch
            + 3 * tm * (2 * ti) * 4)      # in-kernel f32 temporaries


def pick_tile_i(I, vmem_cap=None):
    """Largest 128-lane-aligned intermediate chunk.

    Prefers a divisor of I (no padding).  Capped at 512 on 128-MiB-VMEM chips
    (v5e/v6e) and 256 on 64-MiB chips (v7x) so a large seq tile still fits.
    If no 128-aligned divisor exists, returns the cap and the intermediate dim
    is zero-padded at weight-prep time (exact for the bias-free SwiGLU)."""
    if vmem_cap is None:
        vmem_cap = _vmem_capacity_bytes()
    cap = 512 if vmem_cap >= 96 * 1024 * 1024 else 256
    cap = min(cap, max(128, _round_up(I, 128)))
    best = None
    t = 128
    while t <= cap:
        if I % t == 0:
            best = t
        t += 128
    return best if best is not None else cap


def _pick_tile_m(S, H, ti, x_isz, w_isz, out_isz, vmem_cap):
    """Largest seq tile fitting ~55% of physical VMEM (headroom for the
    compiler's internal scratch).  Bigger tile_m => fewer re-streams of the
    full weight set from HBM (the dominant cost at Qwen2-7B-class shapes)."""
    budget = int(0.55 * vmem_cap)
    s_cap = _round_up(min(max(S, 8), 1024), 8)
    for tm in (1024, 768, 512, 384, 256, 192, 128, 64, 32, 16, 8):
        tm = min(tm, s_cap)
        if _vmem_need_bytes(tm, ti, H, x_isz, w_isz, out_isz) <= budget:
            return tm
    return 8


# --------------------------------------------------------------------------- #
# One-time weight preparation (load time, NOT per forward call)
# --------------------------------------------------------------------------- #
def prepare_qwen2_mlp_weights(gate_w, up_w, down_w, *, tile_i=None,
                              param_dtype=jnp.bfloat16):
    """Fuse gate+up into interleaved [gate_k | up_k] chunks and cast weights.

    gate_w/up_w: (H, I), down_w: (I, H)  -- transposed vs. nn.Linear.weight.
    Returns (gu_w, down_w_c, tile_i):
      gu_w      : (H, 2*I_pad), chunk k is [gate_k | up_k]
      down_w_c  : (I_pad, H)
    I is zero-padded up to a multiple of tile_i (exact: padded SwiGLU columns
    contribute silu(0)*0 = 0).  param_dtype=bf16 gives MXU-native operand rate;
    the kernel keeps SiLU and accumulation in f32.
    """
    H, I = gate_w.shape
    assert up_w.shape == (H, I) and down_w.shape == (I, H)
    if tile_i is None:
        tile_i = pick_tile_i(I)
    assert tile_i % 128 == 0, "tile_i must be 128-lane aligned"

    dt = jnp.dtype(param_dtype) if param_dtype is not None else jnp.dtype(gate_w.dtype)
    gw, uw, dw = gate_w.astype(dt), up_w.astype(dt), down_w.astype(dt)

    I_pad = _round_up(I, tile_i)
    if I_pad != I:
        gw = jnp.pad(gw, ((0, 0), (0, I_pad - I)))
        uw = jnp.pad(uw, ((0, 0), (0, I_pad - I)))
        dw = jnp.pad(dw, ((0, I_pad - I), (0, 0)))

    n_k = I_pad // tile_i
    gu_w = jnp.concatenate(
        [gw.reshape(H, n_k, tile_i), uw.reshape(H, n_k, tile_i)], axis=2
    ).reshape(H, 2 * I_pad)
    return gu_w, dw, tile_i


# --------------------------------------------------------------------------- #
# Kernel
# --------------------------------------------------------------------------- #
def _mlp_kernel(x_ref, gu_ref, dw_ref, o_ref, acc_ref, *, tile_i):
    # x_ref:   (TM, H)      seq tile of hidden_state (resident across k)
    # gu_ref:  (H, 2*TI)    fused [gate_k | up_k] weight chunk
    # dw_ref:  (TI, H)      down_proj weight chunk
    # o_ref:   (TM, H)      output seq tile (written on the last k step)
    # acc_ref: (TM, H) f32  VMEM accumulator over the intermediate (k) axis
    k = pl.program_id(1)

    @pl.when(k == 0)
    def _():
        acc_ref[...] = jnp.zeros_like(acc_ref)

    # Cast activations to the weight (MXU operand) dtype in VMEM; avoids a
    # separate full-tensor pad/cast pass over HBM in the wrapper.
    x = x_ref[...].astype(gu_ref.dtype)

    # One MXU pass for gate+up of this intermediate chunk; f32 accumulation.
    gu = jnp.dot(x, gu_ref[...], preferred_element_type=jnp.float32)  # (TM, 2*TI)
    g = gu[:, :tile_i]   # tile_i % 128 == 0 -> 128-lane aligned, free static views
    u = gu[:, tile_i:]

    # SiLU in f32.  exp + approximate reciprocal both issue on the EUP slot,
    # keeping VALU slots free for the epilogue (matters most on v5e).
    h = g * pl.reciprocal(1.0 + jnp.exp(-g), approx=True) * u

    acc_ref[...] += jnp.dot(h.astype(dw_ref.dtype), dw_ref[...],
                            preferred_element_type=jnp.float32)

    @pl.when(k == pl.num_programs(1) - 1)
    def _():
        o_ref[...] = acc_ref[...].astype(o_ref.dtype)


@functools.partial(jax.jit,
                   static_argnames=("tile_i", "tile_m", "out_dtype",
                                    "vmem_limit_bytes"))
def _mlp_forward(hidden_state, gu_w, dw, *, tile_i, tile_m, out_dtype,
                 vmem_limit_bytes):
    S, H = hidden_state.shape
    n_k = (gu_w.shape[1] // 2) // tile_i
    n_m = pl.cdiv(S, tile_m)   # partial boundary blocks handled by Pallas

    return pl.pallas_call(
        functools.partial(_mlp_kernel, tile_i=tile_i),
        out_shape=jax.ShapeDtypeStruct((S, H), out_dtype),
        grid_spec=pltpu.PrefetchScalarGridSpec(
            num_scalar_prefetch=0,
            grid=(n_m, n_k),                                           # (seq, intermediate)
            in_specs=[
                pl.BlockSpec((tile_m, H), lambda i, k: (i, 0)),        # x (resident over k)
                # NOTE(v6e): if profiling shows per-step weight DMA ~= compute,
                # add pipeline_mode=pl.Buffered(3) to the two weight specs.
                pl.BlockSpec((H, 2 * tile_i), lambda i, k: (0, k)),    # fused gate/up chunk
                pl.BlockSpec((tile_i, H), lambda i, k: (k, 0)),        # down chunk
            ],
            out_specs=pl.BlockSpec((tile_m, H), lambda i, k: (i, 0)),  # out (resident over k)
            scratch_shapes=[pltpu.VMEM((tile_m, H), jnp.float32)],
        ),
        compiler_params=pltpu.CompilerParams(
            dimension_semantics=("parallel", "arbitrary"),
            vmem_limit_bytes=vmem_limit_bytes,
        ),
    )(hidden_state, gu_w, dw)


# --------------------------------------------------------------------------- #
# Public entry points
# --------------------------------------------------------------------------- #
def qwen2_navit_mlp_fused(hidden_state, gu_w, dw, *, tile_i, tile_m=None,
                          out_dtype=None):
    """Per-step SwiGLU MLP forward on pre-fused weights.

    hidden_state: (S, H) packed NaViT token stream (any S; no host padding).
    gu_w, dw: outputs of prepare_qwen2_mlp_weights().
    """
    S, H = hidden_state.shape
    assert gu_w.shape[0] == H and gu_w.shape[1] % (2 * tile_i) == 0
    assert dw.shape == (gu_w.shape[1] // 2, H)

    out_dtype = jnp.dtype(out_dtype) if out_dtype is not None else jnp.dtype(hidden_state.dtype)
    x_isz = jnp.dtype(hidden_state.dtype).itemsize
    w_isz = jnp.dtype(gu_w.dtype).itemsize

    vmem_cap = _vmem_capacity_bytes()
    if tile_m is None:
        tile_m = _pick_tile_m(S, H, tile_i, x_isz, w_isz, out_dtype.itemsize, vmem_cap)
    need = _vmem_need_bytes(tile_m, tile_i, H, x_isz, w_isz, out_dtype.itemsize)
    # Cap at the chip's *physical* VMEM (64 MiB/TC on v7x), with headroom.
    vmem_limit = min(int(0.92 * vmem_cap), max(32 * 1024 * 1024, int(1.4 * need)))

    return _mlp_forward(hidden_state, gu_w, dw, tile_i=tile_i, tile_m=tile_m,
                        out_dtype=out_dtype, vmem_limit_bytes=vmem_limit)


def qwen2_navit_mlp(hidden_state, gate_w, up_w, down_w, *, tile_m=None,
                    tile_i=None, param_dtype=jnp.bfloat16, out_dtype=None):
    """Convenience wrapper: down_proj(silu(x @ gate_w) * (x @ up_w)).

    NOTE: this re-fuses/casts the weights on every call.  In production, call
    prepare_qwen2_mlp_weights() once at weight-load time and use
    qwen2_navit_mlp_fused() per forward step (saves >1 GB of HBM traffic per
    call at 7B-class shapes)."""
    gu_w, dw, tile_i = prepare_qwen2_mlp_weights(
        gate_w, up_w, down_w, tile_i=tile_i, param_dtype=param_dtype)
    return qwen2_navit_mlp_fused(hidden_state, gu_w, dw, tile_i=tile_i,
                                 tile_m=tile_m, out_dtype=out_dtype)


def _reference(hidden_state, gate_w, up_w, down_w):
    g = hidden_state @ gate_w
    u = hidden_state @ up_w
    return (jax.nn.silu(g) * u) @ down_w


# --------------------------------------------------------------------------- #
# Self-test (small Qwen2-like shapes)
# --------------------------------------------------------------------------- #
if __name__ == "__main__":
    # Packed NaViT token stream of 300 tokens (not a multiple of any tile ->
    # exercises partial boundary blocks), hidden=256, intermediate=512.
    seq, hidden_size, intermediate_size = 300, 256, 512

    key = jax.random.PRNGKey(0)
    kx, kg, ku, kd = jax.random.split(key, 4)

    x = jax.random.normal(kx, (seq, hidden_size), dtype=jnp.float32)
    scale = 0.02
    gate_w = scale * jax.random.normal(kg, (hidden_size, intermediate_size), dtype=jnp.float32)
    up_w = scale * jax.random.normal(ku, (hidden_size, intermediate_size), dtype=jnp.float32)
    down_w = scale * jax.random.normal(kd, (intermediate_size, hidden_size), dtype=jnp.float32)

    ref = _reference(x, gate_w, up_w, down_w)

    # (1) f32-operand path with explicit small tiles: exercises multi-seq-tile,
    #     multi-intermediate-chunk accumulation and the partial last seq block.
    out_f32 = qwen2_navit_mlp(x, gate_w, up_w, down_w,
                              param_dtype=jnp.float32, tile_m=128, tile_i=256)
    out_f32 = jax.block_until_ready(out_f32)
    assert out_f32.shape == (seq, hidden_size)
    assert jnp.allclose(out_f32, ref, atol=2e-3, rtol=1e-2), "f32 mismatch vs reference"

    # (2) default path: bf16 MXU operands, generation-aware auto tiles.
    out_bf16 = qwen2_navit_mlp(x, gate_w, up_w, down_w)
    out_bf16 = jax.block_until_ready(out_bf16)
    assert out_bf16.shape == (seq, hidden_size)
    assert jnp.allclose(out_bf16.astype(jnp.float32), ref, atol=5e-3, rtol=5e-2), \
        "bf16 mismatch vs reference"

    # (3) production path: weights fused/cast once, fused forward per step.
    gu_w, dw_c, ti = prepare_qwen2_mlp_weights(gate_w, up_w, down_w, tile_i=256)
    out_fused = jax.block_until_ready(
        qwen2_navit_mlp_fused(x, gu_w, dw_c, tile_i=ti))
    assert out_fused.shape == (seq, hidden_size)
    assert jnp.allclose(out_fused.astype(jnp.float32), ref, atol=5e-3, rtol=5e-2), \
        "fused-weight path mismatch vs reference"

    # (4) ragged intermediate size (384 not a multiple of tile_i=256):
    #     zero-padded weight chunks, result stays exact.
    i2 = 384
    gate2 = scale * jax.random.normal(kg, (hidden_size, i2), dtype=jnp.float32)
    up2 = scale * jax.random.normal(ku, (hidden_size, i2), dtype=jnp.float32)
    down2 = scale * jax.random.normal(kd, (i2, hidden_size), dtype=jnp.float32)
    ref2 = _reference(x, gate2, up2, down2)
    out2 = jax.block_until_ready(
        qwen2_navit_mlp(x, gate2, up2, down2, tile_m=256, tile_i=256))
    assert out2.shape == (seq, hidden_size)
    assert jnp.allclose(out2.astype(jnp.float32), ref2, atol=5e-3, rtol=5e-2), \
        "ragged-I mismatch vs reference"

    print("KERNEL_OK")
</pallas_src>

<mosaic_0001>
module attributes {stable_mosaic.version = 11 : i64} {
  func.func @_mlp_kernel(%arg0: i32, %arg1: i32, %arg2: memref<128x256xf32, #tpu.memory_space<vmem>>, %arg3: memref<256x512xf32, #tpu.memory_space<vmem>>, %arg4: memref<256x256xf32, #tpu.memory_space<vmem>>, %arg5: memref<128x256xf32, #tpu.memory_space<vmem>>, %arg6: memref<128x256xf32, #tpu.memory_space<vmem>>) attributes {dimension_semantics = [#tpu.dimension_semantics<parallel>, #tpu.dimension_semantics<arbitrary>], iteration_bounds = array<i64: 3, 2>, scalar_prefetch = 0 : i64, scratch_operands = 1 : i64, tpu.core_type = #tpu.core_type<tc>, window_params = [{transform_indices = @transform_0, window_bounds = array<i64: 128, 256>}, {transform_indices = @transform_1, window_bounds = array<i64: 256, 512>}, {transform_indices = @transform_2, window_bounds = array<i64: 256, 256>}, {transform_indices = @transform_3, window_bounds = array<i64: 128, 256>}]} {
    %c0_i32 = arith.constant 0 : i32
    %0 = arith.cmpi eq, %arg1, %c0_i32 : i32
    %1 = arith.extui %0 : i1 to i32
    %c0_i32_0 = arith.constant 0 : i32
    %2 = arith.cmpi ne, %1, %c0_i32_0 : i32
    scf.if %2 {
      %cst_14 = arith.constant 0.000000e+00 : f32
      %24 = vector.broadcast %cst_14 : f32 to vector<128x256xf32>
      %c0_15 = arith.constant 0 : index
      %c0_16 = arith.constant 0 : index
      %25 = vector.load %arg6[%c0_15, %c0_16] : memref<128x256xf32, #tpu.memory_space<vmem>>, vector<128x256xf32>
      tpu.vector_store %arg6[%c0_15, %c0_16], %24 {strides = array<i32>} : memref<128x256xf32, #tpu.memory_space<vmem>>, vector<128x256xf32>,
    } else {
    }
    %c0 = arith.constant 0 : index
    %c0_1 = arith.constant 0 : index
    %3 = vector.load %arg2[%c0, %c0_1] : memref<128x256xf32, #tpu.memory_space<vmem>>, vector<128x256xf32>
    %c0_2 = arith.constant 0 : index
    %c0_3 = arith.constant 0 : index
    %4 = vector.load %arg3[%c0_2, %c0_3] : memref<256x512xf32, #tpu.memory_space<vmem>>, vector<256x512xf32>
    %cst = arith.constant dense<0.000000e+00> : vector<128x512xf32>
    %5 = tpu.matmul %3, %4, %cst {dimension_numbers = #tpu.dot_dimension_numbers<[1], [0], [0], [1], [0, 0, 1, 1], [], []>} : vector<128x256xf32>, vector<256x512xf32>, vector<128x512xf32> -> vector<128x512xf32>
    %6 = vector.extract_strided_slice %5 {offsets = [0, 0], sizes = [128, 256], strides = [1, 1]} : vector<128x512xf32> to vector<128x256xf32>
    %7 = vector.extract_strided_slice %5 {offsets = [0, 256], sizes = [128, 256], strides = [1, 1]} : vector<128x512xf32> to vector<128x256xf32>
    %cst_4 = arith.constant 0.000000e+00 : f32
    %8 = vector.broadcast %cst_4 : f32 to vector<128x256xf32>
    %9 = arith.subf %8, %6 : vector<128x256xf32>
    %10 = math.exp %9 : vector<128x256xf32>
    %cst_5 = arith.constant 1.000000e+00 : f32
    %11 = vector.broadcast %cst_5 : f32 to vector<128x256xf32>
    %12 = arith.addf %11, %10 : vector<128x256xf32>
    %13 = tpu.reciprocal %12 {approx = true} : vector<128x256xf32> -> vector<128x256xf32>
    %14 = arith.mulf %6, %13 : vector<128x256xf32>
    %15 = arith.mulf %14, %7 : vector<128x256xf32>
    %c0_6 = arith.constant 0 : index
    %c0_7 = arith.constant 0 : index
    %16 = vector.load %arg6[%c0_6, %c0_7] : memref<128x256xf32, #tpu.memory_space<vmem>>, vector<128x256xf32>
    %c0_8 = arith.constant 0 : index
    %c0_9 = arith.constant 0 : index
    %17 = vector.load %arg4[%c0_8, %c0_9] : memref<256x256xf32, #tpu.memory_space<vmem>>, vector<256x256xf32>
    %cst_10 = arith.constant dense<0.000000e+00> : vector<128x256xf32>
    %18 = tpu.matmul %15, %17, %cst_10 {dimension_numbers = #tpu.dot_dimension_numbers<[1], [0], [0], [1], [0, 0, 1, 1], [], []>} : vector<128x256xf32>, vector<256x256xf32>, vector<128x256xf32> -> vector<128x256xf32>
    %19 = arith.addf %16, %18 : vector<128x256xf32>
    %c0_11 = arith.constant 0 : index
    %c0_12 = arith.constant 0 : index
    %20 = vector.load %arg6[%c0_11, %c0_12] : memref<128x256xf32, #tpu.memory_space<vmem>>, vector<128x256xf32>
    tpu.vector_store %arg6[%c0_11, %c0_12], %19 {strides = array<i32>} : memref<128x256xf32, #tpu.memory_space<vmem>>, vector<128x256xf32>,
    %c1_i32 = arith.constant 1 : i32
    %21 = arith.cmpi eq, %arg1, %c1_i32 : i32
    %22 = arith.extui %21 : i1 to i32
    %c0_i32_13 = arith.constant 0 : i32
    %23 = arith.cmpi ne, %22, %c0_i32_13 : i32
    scf.if %23 {
      %c0_14 = arith.constant 0 : index
      %c0_15 = arith.constant 0 : index
      %24 = vector.load %arg6[%c0_14, %c0_15] : memref<128x256xf32, #tpu.memory_space<vmem>>, vector<128x256xf32>
      %c0_16 = arith.constant 0 : index
      %c0_17 = arith.constant 0 : index
      %25 = vector.load %arg5[%c0_16, %c0_17] : memref<128x256xf32, #tpu.memory_space<vmem>>, vector<128x256xf32>
      tpu.vector_store %arg5[%c0_16, %c0_17], %24 {strides = array<i32>} : memref<128x256xf32, #tpu.memory_space<vmem>>, vector<128x256xf32>,
    } else {
    }
    return
  }
  func.func @transform_0(%arg0: i32, %arg1: i32) -> (i32, i32) {
    %c0_i32 = arith.constant 0 : i32
    %c0_i32_0 = arith.constant 0 : i32
    return %arg0, %c0_i32 : i32, i32
  }
  func.func @transform_1(%arg0: i32, %arg1: i32) -> (i32, i32) {
    %c0_i32 = arith.constant 0 : i32
    %c0_i32_0 = arith.constant 0 : i32
    return %c0_i32, %arg1 : i32, i32
  }
  func.func @transform_2(%arg0: i32, %arg1: i32) -> (i32, i32) {
    %c0_i32 = arith.constant 0 : i32
    %c0_i32_0 = arith.constant 0 : i32
    return %arg1, %c0_i32 : i32, i32
  }
  func.func @transform_3(%arg0: i32, %arg1: i32) -> (i32, i32) {
    %c0_i32 = arith.constant 0 : i32
    %c0_i32_0 = arith.constant 0 : i32
    return %arg0, %c0_i32 : i32, i32
  }
}

</mosaic_0001>

<bundles_post_ra>
// kernel: _mlp_forward.1
= control target key start
LH: loop header
LB: loop body
LE: loop exit
PB: predicated region body
PF: predicated region fallthrough
CT: control target
= control target key end

     0   :  { %s3164_s0 = inlined_call_operand.hbm [shape: f32[300,256], index: 0, kind: input, shape index: {}]   ;;  %s3165_s1 = inlined_call_operand.hbm [shape: f32[256,1024], index: 1, kind: input, shape index: {}]   ;;  %s3166_s2 = inlined_call_operand.hbm [shape: f32[512,256], index: 2, kind: input, shape index: {}]   ;;  %s3167_s3 = inlined_call_operand.hbm [shape: f32[300,256], index: 3, kind: output, shape index: {}]  }
   0x1   :  { %3174 = sst [smem:[#allocation19_spill]] %s3164_s0 }
   0x2   :  { %3175 = sst [smem:[#allocation20_spill]] %s3165_s1 }
   0x3   :  { %8 = vsyncpa [#allocation4], 0 }
   0x4   :  { %10 = vsyncpa [#allocation4 + $0x1], 0 }
   0x5   :  { %11 = vsyncpa [#allocation7], 0 }
   0x6   :  { %13 = vsyncpa [#allocation7 + $0x1], 0 }
   0x7   :  { %14 = vsyncpa [#allocation5], 0 }
   0x8   :  { %16 = vsyncpa [#allocation5 + $0x1], 0  ;;  %s2335_s12 = smov 0   ;;  %s2337_s13 = smov 0  }
   0x9   :  { %s2339_s14 = smov 0   ;;  %s2341_s15 = smov 0  }
   0xa   :  { %s2343_s16 = smov 0   ;;  %s2345_s17 = smov 0  }
   0xb   :  { %s2347_s18 = smov 0   ;;  %s2349_s19 = smov 0  }
   0xc   :  { %s2351_s20 = smov 0   ;;  %s2353_s21 = smov 0  }
   0xd   :  { %s2355_s22 = smov 0  }
   0xe LB: > { %3176 = sst [smem:[#allocation13_spill]] %s2279_s17  ;;  %s2391_s23 = sadd.s32 4294967295, %s2299_s22   ;;  %s2299_s22 = sphi %s2355_s22, %s22_s22   ;;  %s2295_s21 = sphi %s2353_s21, %s3207_s21   ;;  %s2291_s20 = sphi %s2351_s20, %s3206_s20   ;;  %s2287_s19 = sphi %s2349_s19, %s3197_s19   ;;  %s2283_s18 = sphi %s2347_s18, %s3205_s18   ;;  %s2279_s17 = sphi %s2345_s17, %s3196_s17   ;;  %s2275_s16 = sphi %s2343_s16, %s3204_s16   ;;  %s2271_s15 = sphi %s2341_s15, %s3203_s15   ;;  %s2267_s14 = sphi %s2339_s14, %s3202_s14   ;;  %s2263_s13 = sphi %s2337_s13, %s3201_s13   ;;  %s2259_s12 = sphi %s2335_s12, %s3200_s12  }
   0xf   : > { %3177 = sst [smem:[#allocation14_spill]] %s2295_s21  ;;  %s1582_s24 = sadd.s32 4294967294, %s2299_s22  }
  0x10   : > { %s31_s25 = sadd.s32 1, %s2291_s20  ;;  %s34_s26 = sadd.s32 1, %s2295_s21 }
  0x11   : > { %p32_p0 = scmp.ge.s32.totalorder %s31_s25, 2  ;;  %s41_s27 = sadd.s32 1, %s2279_s17 }
  0x12   : > { %p48_p1 = scmp.ne.s32.totalorder %s2279_s17, %s2275_s16  ;;  %p49_p2 = scmp.eq.s32.totalorder %s2299_s22, 0 }
  0x13   : > { %s3209_s25 = smov (%p32_p0, %s31_s25), 0  ;;  %s3211_s26 = smov (!%p32_p0, %s34_s26), %s2295_s21 }
  0x14   : > { %3178 = sst [smem:[#allocation15_spill]] %s3209_s25  ;;  %p2408_p3 = por %p49_p2, %p48_p1 }
  0x15   : > { %p3168_p4 = scmp.ne.s32.totalorder %s2275_s16, %s2271_s15  ;;  %p36_p5 = scmp.ge.s32.totalorder %s3211_s26, 3 }
  0x16   : > { %p55_p6 = scmp.eq.s32.totalorder %s2391_s23, 0  ;;  %s64_s29 = ssub.s32 %s2291_s20, %s3209_s25 }
  0x17   : > { %s67_s30 = sadd.s32 1, %s2267_s14  ;;  %s3213_s26 = smov (%p36_p5, %s3211_s26), 0 }
  0x18   : > { %3180 = sst [smem:[#allocation16_spill]] %s3213_s26  ;;  %p2425_p7 = por %p55_p6, %p3168_p4 }
  0x19   : > { %p65_p8 = scmp.eq.s32.totalorder %s64_s29, 0  ;;  %s38_s5 = ssub.s32 %s2295_s21, %s3213_s26 }
  0x1a   : > { %p74_p9 = scmp.ne.s32.totalorder %s2267_s14, %s2263_s13  ;;  %p39_p10 = scmp.eq.s32.totalorder %s38_s5, 0 }
  0x1b   : > { %p80_p11 = scmp.ne.s32.totalorder %s2263_s13, %s2259_s12  ;;  %p130_p0 = scmp.eq.s32.totalorder %s2391_s23, 5 }
  0x1c   : > { %s2436_s6 = scalar_select %p65_p8, %s2267_s14, %s67_s30  }
  0x1d   : > { %s2439_s7 = scalar_select %p39_p10, %s2279_s17, %s41_s27  }
  0x1e   : > { %3182 = sst [smem:[#allocation17_spill]] %s2436_s6  ;;  %p2443_p12 = por %p74_p9, %p49_p2 }
  0x1f   : > { %3183 = sst [smem:[#allocation18_spill]] %s2439_s7  ;;  %p2449_p13 = por %p80_p11, %p55_p6 }
  0x20   : > { %p136_p5 = scmp.eq.s32.totalorder %s1582_s24, 5  ;;  %p2457_p4 = por %p130_p0, %p48_p1 }
  0x21   : > { %s3185_s9 = scalar_select %p2449_p13, 1, 0 }
  0x22   : > { %s3186_s10 = scalar_select %p2457_p4, 1, 0 }
  0x23   : > { %p3187_p8 = scmp.ne.s32.totalorder %s2275_s16, %s2271_s15  ;;  %p1584_p2 = scmp.ge.s32.totalorder %s2299_s22, 6 }
  0x25   : > { %p2464_p10 = por %p136_p5, %p3187_p8  ;;  %152 = sbr.rel (%p1584_p2) target bundleno = 141 (0x8d), region = 16 }
  0x27   : > { %s3188_s11 = scalar_select %p2464_p10, 1, 0 }
  0x2c   : > { %155 = sbr.rel (!%p2408_p3) target bundleno = 84 (0x54), region = 20  ;;  %s156_s12 = sand.u32 (%p2408_p3), 1, %s2279_s17  }
  0x2d   : > { %s1586_s24 = sshll.u32 (%p2408_p3), %s2295_s21, 4  ;;  %s1585_s27 = sshll.u32 (%p2408_p3), %s156_s12, 8 }
  0x2e   : > { %s162_s29 = ssub.s32 (%p2408_p3), 38, %s1586_s24  ;;  %s2476_s26 = scalar_lea.sflag (%p2408_p3), [#allocation4], %s156_s12 }
  0x2f   : > { %p163_p1 = scmp.lt.s32.totalorder (%p2408_p3), %s162_s29, 16  ;;  %s160_s25 = scalar_lea.vmem (%p2408_p3), [#allocation3], %s1585_s27 }
  0x33   : > { %s3215_s29 = smov (!%p163_p1, %s162_s29), 16 }
  0x34   : > { %s2473_s30 = sshll.u32 %s3215_s29, 8 }
  0x35   : > { %s168_s5 = ssub.s32 4096, %s2473_s30 }
  0x36   : > { %169 = vsyncadd %s2476_s26, %s168_s5  ;;  %p1589_p3 = scmp.ne.s32.totalorder %s2473_s30, 0  ;;  %s1621_s28 = sshll.u32 %s2295_s21, 12 }
  0x37   : > { %s3189_s0 = sld [smem:[#allocation19_spill]]  ;;  %s175_s12 = sshll.u32 %s160_s25, 4  ;;  %s2486_s12 = int_to_ptr.vmem [resolvable:$true] %s175_s12 }
  0x3d   : > { %s2484_s24 = scalar_lea.hbm %s3189_s0, %s1621_s28  ;;  %s2093_s21 = scalar_lea.hbm %s3189_s0, 9728 }
  0x3e   : > { %s2089_s27 = scalar_lea.hbm %s2484_s24, %s2473_s30  ;;  %p2094_p0 = scmp.lt.u32.totalorder %s2484_s24, %s3189_s0 }
  0x3f   : > { %p2090_p6 = scmp.ne.s32.totalorder %s2484_s24, %s2089_s27  ;;  %p2095_p5 = scmp.lt.u32.totalorder %s2093_s21, %s2089_s27 }
  0x40   : > { %p2097_p2 = scmp.lt.u32.totalorder %s2089_s27, %s2484_s24 }
  0x41   : > { %p2091_p9 = pnand %p2090_p6, %p1589_p3  ;;  %p2096_p8 = por %p2095_p5, %p2094_p0 }
  0x43   : > { %p2092_p11 = pneg %p2091_p9  ;;  %p2098_p1 = por %p2097_p2, %p2096_p8 }
  0x45   : > { %p2099_p10 = pnand %p2098_p1, %p2092_p11 }
  0x47   : > { %2102 = shalt.err (!%p2099_p10)
}
  0x48   : > { %s2103_s25 = scalar_lea.vmem %s2486_s12, %s2473_s30  ;;  %s2301_s7 = smov [#allocation3]  }
  0x49   : > { %p2104_p6 = scmp.ne.s32.totalorder %s2486_s12, %s2103_s25  ;;  %s2107_s28 = sshll.u32 %s2301_s7, 4  ;;  %s2108_s28 = int_to_ptr.vmem [resolvable:$false] %s2107_s28 }
  0x4a   : > { %s2109_s6 = scalar_lea.vmem %s2108_s28, 8192  ;;  %p2110_p13 = scmp.lt.s32.totalorder %s2486_s12, %s2108_s28 }
  0x4b   : > { %p2105_p9 = pnand %p2104_p6, %p1589_p3  ;;  %p2111_p0 = scmp.lt.s32.totalorder %s2109_s6, %s2103_s25 }
  0x4d   : > { %p2106_p4 = pneg %p2105_p9  ;;  %p2112_p5 = por %p2111_p0, %p2110_p13 }
  0x4f   : > { %p2113_p8 = pnand %p2112_p5, %p2106_p4 }
  0x51   : > { %2116 = shalt.err (!%p2113_p8)
}
  0x52   : > { %s2302_s21 = smov 256   ;;  %s2303_s27 = smov 16  }
  0x53   : > { %181 = dma.hbm_to_vmem [thread:$0]  (%p1589_p3), %s2484_s24, %s2473_s30, %s2486_s12, %s2476_s26, %s2302_s21, %s2302_s21, %s2303_s27  }
  0x54 PF: > { %s185_s29 = sand.u32 1, %s2299_s22   ;;  %s187_s5 = sand.u32 1, %s2267_s14  }
  0x55   : > { %s1594_s17 = sshll.u32 %s187_s5, 10  ;;  %s1622_s25 = sshll.u32 %s2291_s20, 9 }
  0x56   : > { %s3190_s1 = sld [smem:[#allocation20_spill]]  ;;  %s189_s26 = scalar_lea.vmem [#allocation6], %s1594_s17 }
  0x57   : > { %s196_s30 = sshll.u32 %s189_s26, 4  ;;  %s2525_s24 = scalar_lea.sflag [#allocation7], %s185_s29  ;;  %s2523_s30 = int_to_ptr.vmem [resolvable:$true] %s196_s30 }
  0x5c   : > { %s2521_s6 = scalar_lea.hbm %s3190_s1, %s1622_s25  ;;  %s2121_s25 = scalar_lea.hbm %s3190_s1, 32768 }
  0x5d   : > { %s2117_s12 = scalar_lea.hbm %s2521_s6, 16384  ;;  %p2122_p3 = scmp.lt.u32.totalorder %s2521_s6, %s3190_s1 }
  0x5e   : > { %p2118_p4 = scmp.ne.s32.totalorder %s2521_s6, %s2117_s12  ;;  %p2123_p11 = scmp.lt.u32.totalorder %s2121_s25, %s2117_s12 }
  0x5f   : > { %p2125_p1 = scmp.lt.u32.totalorder %s2117_s12, %s2521_s6 }
  0x60   : > { %p2119_p13 = pnand %p2118_p4, %p2443_p12  ;;  %p2124_p2 = por %p2123_p11, %p2122_p3 }
  0x62   : > { %p2120_p10 = pneg %p2119_p13  ;;  %p2126_p6 = por %p2125_p1, %p2124_p2 }
  0x64   : > { %p2127_p9 = pnand %p2126_p6, %p2120_p10 }
  0x66   : > { %2130 = shalt.err (!%p2127_p9)
}
  0x67   : > { %s2131_s29 = scalar_lea.vmem %s2523_s30, 16384  ;;  %s2304_s17 = smov [#allocation6]  }
  0x68   : > { %p2132_p0 = scmp.ne.s32.totalorder %s2523_s30, %s2131_s29  ;;  %s2135_s26 = sshll.u32 %s2304_s17, 4  ;;  %s2136_s26 = int_to_ptr.vmem [resolvable:$false] %s2135_s26 }
  0x69   : > { %s2137_s21 = scalar_lea.vmem %s2136_s26, 32768  ;;  %p2138_p4 = scmp.lt.s32.totalorder %s2523_s30, %s2136_s26 }
  0x6a   : > { %p2133_p5 = pnand %p2132_p0, %p2443_p12  ;;  %p2139_p13 = scmp.lt.s32.totalorder %s2137_s21, %s2131_s29 }
  0x6c   : > { %p2134_p8 = pneg %p2133_p5  ;;  %p2140_p3 = por %p2139_p13, %p2138_p4 }
  0x6e   : > { %p2141_p11 = pnand %p2140_p3, %p2134_p8 }
  0x70   : > { %2144 = shalt.err (!%p2141_p11)
}
  0x71   : > { %s2305_s12 = smov 1024   ;;  %s2306_s27 = smov 512  }
  0x72   : > { %s2307_s25 = smov 32   ;;  %s1597_s7 = sshll.u32 %s187_s5, 9 }
  0x73   : > { %1852 = dma.hbm_to_vmem [thread:$0]  (%p2443_p12), %s2521_s6, 16384, %s2523_s30, %s2525_s24, %s2305_s12, %s2306_s27, %s2307_s25  }
  0x74   : > { %s1624_s28 = sshll.u32 %s2291_s20, 13  ;;  %s210_s21 = scalar_lea.vmem [#allocation8], %s1597_s7 }
  0x75   : > { %s2555_s26 = scalar_lea.hbm %s3166_s2, %s1624_s28  ;;  %s218_s0 = sshll.u32 %s210_s21, 4  ;;  %s2557_s0 = int_to_ptr.vmem [resolvable:$true] %s218_s0 }
  0x76   : > { %s2145_s1 = scalar_lea.hbm %s2555_s26, 8192  ;;  %s2149_s30 = scalar_lea.hbm %s3166_s2, 16384 }
  0x77   : > { %p2146_p10 = scmp.ne.s32.totalorder %s2555_s26, %s2145_s1  ;;  %p2150_p6 = scmp.lt.u32.totalorder %s2555_s26, %s3166_s2 }
  0x78   : > { %p2151_p9 = scmp.lt.u32.totalorder %s2149_s30, %s2145_s1  ;;  %p2153_p5 = scmp.lt.u32.totalorder %s2145_s1, %s2555_s26 }
  0x79   : > { %p2147_p2 = pnand %p2146_p10, %p2443_p12 }
  0x7a   : > { %p2152_p0 = por %p2151_p9, %p2150_p6 }
  0x7b   : > { %p2148_p1 = pneg %p2147_p2 }
  0x7c   : > { %p2154_p8 = por %p2153_p5, %p2152_p0 }
  0x7e   : > { %p2155_p4 = pnand %p2154_p8, %p2148_p1 }
  0x80   : > { %2158 = shalt.err (!%p2155_p4)
}
  0x81   : > { %s2159_s25 = scalar_lea.vmem %s2557_s0, 8192  ;;  %s2308_s7 = smov [#allocation8]  }
  0x82   : > { %p2160_p13 = scmp.ne.s32.totalorder %s2557_s0, %s2159_s25  ;;  %s2163_s28 = sshll.u32 %s2308_s7, 4  ;;  %s2164_s28 = int_to_ptr.vmem [resolvable:$false] %s2163_s28 }
  0x83   : > { %s2165_s17 = scalar_lea.vmem %s2164_s28, 16384  ;;  %p2166_p10 = scmp.lt.s32.totalorder %s2557_s0, %s2164_s28 }
  0x84   : > { %p2161_p3 = pnand %p2160_p13, %p2443_p12  ;;  %p2167_p2 = scmp.lt.s32.totalorder %s2165_s17, %s2159_s25 }
  0x86   : > { %p2162_p11 = pneg %p2161_p3  ;;  %p2168_p6 = por %p2167_p2, %p2166_p10 }
  0x88   : > { %p2169_p9 = pnand %p2168_p6, %p2162_p11 }
  0x8a   : > { %2172 = shalt.err (!%p2169_p9)
}
  0x8b   : > { %s2309_s1 = smov 256   ;;  %s2310_s29 = smov 16  }
  0x8c   : > { %1853 = dma.hbm_to_vmem [thread:$0]  (%p2443_p12), %s2555_s26, 8192, %s2557_s0, %s2525_s24, %s2309_s1, %s2309_s1, %s2310_s29  }
  0x8d PF: > { %p1601_p1 = scmp.ge.s32.totalorder %s2299_s22, 1  ;;  %p226_p0 = scmp.lt.s32.totalorder %s2299_s22, 7 }
  0x8f   : > { %p227_p5 = pnand %p1601_p1, %p226_p0 }
  0x90   : > { %s2584_s21 = sand.u32 (!%p227_p5), 1, %s2275_s16  }
  0x91   : > { %230 = sbr.rel (%p227_p5) target bundleno = 815 (0x32f), region = 32  ;;  %s1602_s5 = sshll.u32 (!%p227_p5), %s2584_s21, 8 }
  0x92   : > { %s233_s6 = scalar_lea.sflag (!%p227_p5), [#allocation4], %s2584_s21  ;;  %s2588_s30 = scalar_lea.vmem (!%p227_p5), [#allocation3], %s1602_s5 }
  0x98   : > { %2246 = dma.done.wait (%p2425_p7), %s233_s6, 4096  }
  0x99   : > { %2248 = vsyncadd (%p2425_p7), %s233_s6, 4294963200  ;;  %s241_s0 = sand.u32 1, %s2391_s23   ;;  %s243_s8 = sand.u32 1, %s2263_s13  }
  0x9a   : > { %s1603_s24 = sshll.u32 %s243_s8, 10  ;;  %s242_s26 = scalar_lea.sflag [#allocation7], %s241_s0 }
  0x9b   : > { %s2596_s12 = scalar_lea.vmem [#allocation6], %s1603_s24  ;;  %p3191_p12 = scmp.ne.s32.totalorder %s3185_s9, 0 }
  0x9d   : > { %2250 = dma.done.wait (%p3191_p12), %s242_s26, 24576  }
  0x9e   : > { %2252 = vsyncadd (%p3191_p12), %s242_s26, 4294942720  ;;  %s1604_s27 = sshll.u32 %s243_s8, 9  ;;  %s2604_s7 = scalar_lea.vmem [#allocation9], %s1602_s5 }
  0x9f   : > { %s2602_s25 = scalar_lea.vmem [#allocation8], %s1604_s27  ;;  %p1606_p7 = scmp.ne.s32.totalorder %s2283_s18, 0 }
  0xa0   : > { %v2311_v0 = vmov (!%p1606_p7), 0.0  }
  0xa1   : > { %304 = sbr.rel (%p1606_p7) target bundleno = 177 (0xb1), region = 48  ;;  %305 = vst [vmem:[#allocation2] sm:$0xff] (!%p1606_p7), %v2311_v0  ;;  %306 = vst [vmem:[#allocation2 + $0x8] sm:$0xff] (!%p1606_p7), %v2311_v0 }
  0xa2   : > { %307 = vst [vmem:[#allocation2 + $0x10] sm:$0xff] (!%p1606_p7), %v2311_v0  ;;  %308 = vst [vmem:[#allocation2 + $0x18] sm:$0xff] (!%p1606_p7), %v2311_v0 }
  0xa3   : > { %309 = vst [vmem:[#allocation2 + $0x20] sm:$0xff] (!%p1606_p7), %v2311_v0  ;;  %310 = vst [vmem:[#allocation2 + $0x28] sm:$0xff] (!%p1606_p7), %v2311_v0 }
  0xa4   : > { %311 = vst [vmem:[#allocation2 + $0x30] sm:$0xff] (!%p1606_p7), %v2311_v0  ;;  %312 = vst [vmem:[#allocation2 + $0x38] sm:$0xff] (!%p1606_p7), %v2311_v0 }
  0xa5   : > { %313 = vst [vmem:[#allocation2 + $0x40] sm:$0xff] (!%p1606_p7), %v2311_v0  ;;  %314 = vst [vmem:[#allocation2 + $0x48] sm:$0xff] (!%p1606_p7), %v2311_v0 }
  0xa6   : > { %315 = vst [vmem:[#allocation2 + $0x50] sm:$0xff] (!%p1606_p7), %v2311_v0  ;;  %316 = vst [vmem:[#allocation2 + $0x58] sm:$0xff] (!%p1606_p7), %v2311_v0 }
  0xa7   : > { %317 = vst [vmem:[#allocation2 + $0x60] sm:$0xff] (!%p1606_p7), %v2311_v0  ;;  %318 = vst [vmem:[#allocation2 + $0x68] sm:$0xff] (!%p1606_p7), %v2311_v0 }
  0xa8   : > { %319 = vst [vmem:[#allocation2 + $0x70] sm:$0xff] %v2311_v0  ;;  %320 = vst [vmem:[#allocation2 + $0x78] sm:$0xff] %v2311_v0 }
  0xa9   : > { %321 = vst [vmem:[#allocation2 + $0x80] sm:$0xff] %v2311_v0  ;;  %322 = vst [vmem:[#allocation2 + $0x88] sm:$0xff] %v2311_v0 }
  0xaa   : > { %323 = vst [vmem:[#allocation2 + $0x90] sm:$0xff] %v2311_v0  ;;  %324 = vst [vmem:[#allocation2 + $0x98] sm:$0xff] %v2311_v0 }
  0xab   : > { %325 = vst [vmem:[#allocation2 + $0xa0] sm:$0xff] %v2311_v0  ;;  %326 = vst [vmem:[#allocation2 + $0xa8] sm:$0xff] %v2311_v0 }
  0xac   : > { %327 = vst [vmem:[#allocation2 + $0xb0] sm:$0xff] %v2311_v0  ;;  %328 = vst [vmem:[#allocation2 + $0xb8] sm:$0xff] %v2311_v0 }
  0xad   : > { %329 = vst [vmem:[#allocation2 + $0xc0] sm:$0xff] %v2311_v0  ;;  %330 = vst [vmem:[#allocation2 + $0xc8] sm:$0xff] %v2311_v0 }
  0xae   : > { %331 = vst [vmem:[#allocation2 + $0xd0] sm:$0xff] %v2311_v0  ;;  %332 = vst [vmem:[#allocation2 + $0xd8] sm:$0xff] %v2311_v0 }
  0xaf   : > { %333 = vst [vmem:[#allocation2 + $0xe0] sm:$0xff] %v2311_v0  ;;  %334 = vst [vmem:[#allocation2 + $0xe8] sm:$0xff] %v2311_v0 }
  0xb0   : > { %335 = vst [vmem:[#allocation2 + $0xf0] sm:$0xff] %v2311_v0  ;;  %336 = vst [vmem:[#allocation2 + $0xf8] sm:$0xff] %v2311_v0 }
  0xb1 PF: > { %v370_v1 = vld [vmem:[%s2596_s12 + $0x8] sm:$0xff]  ;;  %v369_v3 = vld [vmem:[%s2596_s12] sm:$0xff]  ;;  %v372_v26 = vld [vmem:[%s2596_s12 + $0x18] sm:$0xff]  ;;  %p1607_p8 = scmp.ne.s32.totalorder %s2283_s18, 1 }
  0xb2   : > { %v374_v2 = vld [vmem:[%s2596_s12 + $0x28] sm:$0xff]  ;;  %v373_v5 = vld [vmem:[%s2596_s12 + $0x20] sm:$0xff]  ;;  %v376_v27 = vld [vmem:[%s2596_s12 + $0x38] sm:$0xff] }
  0xb3   : > { %v1628_v4 = vpack.c.bf16 %v374_v2, %v370_v1  ;;  %v378_v6 = vld [vmem:[%s2596_s12 + $0x48] sm:$0xff]  ;;  %v1630_v8 = vpack.c.bf16 %v373_v5, %v369_v3  ;;  %v377_v10 = vld [vmem:[%s2596_s12 + $0x40] sm:$0xff]  ;;  %v371_v28 = vld [vmem:[%s2596_s12 + $0x10] sm:$0xff]  ;;  %v1692_v33 = vpack.c.bf16 %v376_v27, %v372_v26 }
  0xb4   : > { %v382_v7 = vld [vmem:[%s2596_s12 + $0x68] sm:$0xff]  ;;  %v381_v11 = vld [vmem:[%s2596_s12 + $0x60] sm:$0xff]  ;;  %v375_v29 = vld [vmem:[%s2596_s12 + $0x30] sm:$0xff] }
  0xb5   : > { %v1632_v9 = vpack.c.bf16 %v382_v7, %v378_v6  ;;  %v386_v12 = vld [vmem:[%s2596_s12 + $0x88] sm:$0xff]  ;;  %1629 = vmatprep.subr.bf16.mxu0 %v1628_v4  ;;  %v1634_v14 = vpack.c.bf16 %v381_v11, %v377_v10  ;;  %v385_v16 = vld [vmem:[%s2596_s12 + $0x80] sm:$0xff]  ;;  %v1694_v34 = vpack.c.bf16 %v375_v29, %v371_v28  ;;  %v380_v37 = vld [vmem:[%s2596_s12 + $0x58] sm:$0xff]  ;;  %1693 = vmatprep.subr.bf16.mxu1 %v1692_v33 }
  0xb6   : > { %v390_v13 = vld [vmem:[%s2596_s12 + $0xa8] sm:$0xff]  ;;  %1631 = vmatpush1.bf16.msra.mxu0 %v1630_v8  ;;  %v389_v17 = vld [vmem:[%s2596_s12 + $0xa0] sm:$0xff]  ;;  %v384_v38 = vld [vmem:[%s2596_s12 + $0x78] sm:$0xff] }
  0xb7   : > { %1633 = vmatprep.subr.bf16.mxu0 %v1632_v9  ;;  %v1636_v15 = vpack.c.bf16 %v390_v13, %v386_v12  ;;  %v394_v18 = vld [vmem:[%s2596_s12 + $0xc8] sm:$0xff]  ;;  %v1638_v20 = vpack.c.bf16 %v389_v17, %v385_v16  ;;  %v393_v22 = vld [vmem:[%s2596_s12 + $0xc0] sm:$0xff]  ;;  %v1696_v40 = vpack.c.bf16 %v384_v38, %v380_v37  ;;  %v379_v41 = vld [vmem:[%s2596_s12 + $0x50] sm:$0xff]  ;;  %1695 = vmatpush1.bf16.msra.mxu1 %v1694_v34 }
  0xb8   : > { %v398_v19 = vld [vmem:[%s2596_s12 + $0xe8] sm:$0xff]  ;;  %v397_v23 = vld [vmem:[%s2596_s12 + $0xe0] sm:$0xff]  ;;  %v383_v42 = vld [vmem:[%s2596_s12 + $0x70] sm:$0xff] }
  0xb9   : > { %v1640_v21 = vpack.c.bf16 %v398_v19, %v394_v18  ;;  %v402_v24 = vld [vmem:[%s2596_s12 + $0x108] sm:$0xff]  ;;  %v1642_v30 = vpack.c.bf16 %v397_v23, %v393_v22  ;;  %v401_v31 = vld [vmem:[%s2596_s12 + $0x100] sm:$0xff]  ;;  %v1698_v43 = vpack.c.bf16 %v383_v42, %v379_v41  ;;  %1697 = vmatprep.subr.bf16.mxu1 %v1696_v40  ;;  %v388_v45 = vld [vmem:[%s2596_s12 + $0x98] sm:$0xff] }
  0xba   : > { %1635 = vmatpush1.bf16.msra.mxu0 %v1634_v14  ;;  %v406_v25 = vld [vmem:[%s2596_s12 + $0x128] sm:$0xff]  ;;  %v405_v32 = vld [vmem:[%s2596_s12 + $0x120] sm:$0xff]  ;;  %v392_v46 = vld [vmem:[%s2596_s12 + $0xb8] sm:$0xff] }
  0xbb   : > { %1637 = vmatprep.subr.bf16.mxu0 %v1636_v15  ;;  %v1644_v35 = vpack.c.bf16 %v406_v25, %v402_v24  ;;  %v410_v36 = vld [vmem:[%s2596_s12 + $0x148] sm:$0xff]  ;;  %v1646_v44 = vpack.c.bf16 %v405_v32, %v401_v31  ;;  %v387_v47 = vld [vmem:[%s2596_s12 + $0x90] sm:$0xff]  ;;  %v409_v49 = vld [vmem:[%s2596_s12 + $0x140] sm:$0xff]  ;;  %v1700_v51 = vpack.c.bf16 %v392_v46, %v388_v45  ;;  %1699 = vmatpush1.bf16.msra.mxu1 %v1698_v43 }
  0xbc   : > { %v414_v39 = vld [vmem:[%s2596_s12 + $0x168] sm:$0xff]  ;;  %v413_v50 = vld [vmem:[%s2596_s12 + $0x160] sm:$0xff]  ;;  %v391_v52 = vld [vmem:[%s2596_s12 + $0xb0] sm:$0xff] }
  0xbd   : > { %v1648_v48 = vpack.c.bf16 %v414_v39, %v410_v36  ;;  %v418_v53 = vld [vmem:[%s2596_s12 + $0x188] sm:$0xff]  ;;  %v396_v55 = vld [vmem:[%s2596_s12 + $0xd8] sm:$0xff]  ;;  %v1702_v56 = vpack.c.bf16 %v391_v52, %v387_v47  ;;  %v1650_v58 = vpack.c.bf16 %v413_v50, %v409_v49  ;;  %v417_v59 = vld [vmem:[%s2596_s12 + $0x180] sm:$0xff]  ;;  %1701 = vmatprep.subr.bf16.mxu1 %v1700_v51 }
  0xbe   : > { %1639 = vmatpush1.bf16.msra.mxu0 %v1638_v20  ;;  %v422_v54 = vld [vmem:[%s2596_s12 + $0x1a8] sm:$0xff]  ;;  %v400_v57 = vld [vmem:[%s2596_s12 + $0xf8] sm:$0xff]  ;;  %v395_v61 = vld [vmem:[%s2596_s12 + $0xd0] sm:$0xff] }
  0xbf   : > { %1641 = vmatprep.subr.bf16.mxu0 %v1640_v21  ;;  %v1704_v60 = vpack.c.bf16 %v400_v57, %v396_v55  ;;  %v399_v62 = vld [vmem:[%s2596_s12 + $0xf0] sm:$0xff]  ;;  %v1652_v63 = vpack.c.bf16 %v422_v54, %v418_v53  ;;  %v421_v0 = vld [vmem:[%s2596_s12 + $0x1a0] sm:$0xff]  ;;  %v404_v1 = vld [vmem:[%s2596_s12 + $0x118] sm:$0xff]  ;;  %1703 = vmatpush1.bf16.msra.mxu1 %v1702_v56 }
  0xc0   : > { %v408_v2 = vld [vmem:[%s2596_s12 + $0x138] sm:$0xff]  ;;  %v426_v3 = vld [vmem:[%s2596_s12 + $0x1c8] sm:$0xff]  ;;  %v1706_v5 = vpack.c.bf16 %v399_v62, %v395_v61  ;;  %v1654_v6 = vpack.c.bf16 %v421_v0, %v417_v59  ;;  %v425_v7 = vld [vmem:[%s2596_s12 + $0x1c0] sm:$0xff] }
  0xc1   : > { %v430_v4 = vld [vmem:[%s2596_s12 + $0x1e8] sm:$0xff]  ;;  %1705 = vmatprep.subr.bf16.mxu1 %v1704_v60  ;;  %v1708_v8 = vpack.c.bf16 %v408_v2, %v404_v1  ;;  %v403_v9 = vld [vmem:[%s2596_s12 + $0x110] sm:$0xff]  ;;  %v429_v12 = vld [vmem:[%s2596_s12 + $0x1e0] sm:$0xff] }
  0xc2   : > { %1643 = vmatpush1.bf16.msra.mxu0 %v1642_v30  ;;  %v407_v10 = vld [vmem:[%s2596_s12 + $0x130] sm:$0xff]  ;;  %v1656_v11 = vpack.c.bf16 %v430_v4, %v426_v3  ;;  %v412_v13 = vld [vmem:[%s2596_s12 + $0x158] sm:$0xff]  ;;  %v434_v15 = vld [vmem:[%s2596_s12 + $0x208] sm:$0xff]  ;;  %v1658_v18 = vpack.c.bf16 %v429_v12, %v425_v7 }
  0xc3   : > { %1645 = vmatprep.subr.bf16.mxu0 %v1644_v35  ;;  %v416_v14 = vld [vmem:[%s2596_s12 + $0x178] sm:$0xff]  ;;  %v438_v16 = vld [vmem:[%s2596_s12 + $0x228] sm:$0xff]  ;;  %1707 = vmatpush1.bf16.msra.mxu1 %v1706_v5  ;;  %v1710_v17 = vpack.c.bf16 %v407_v10, %v403_v9  ;;  %v433_v19 = vld [vmem:[%s2596_s12 + $0x200] sm:$0xff] }
  0xc4   : > { %1709 = vmatprep.subr.bf16.mxu1 %v1708_v8  ;;  %v1712_v20 = vpack.c.bf16 %v416_v14, %v412_v13  ;;  %v411_v21 = vld [vmem:[%s2596_s12 + $0x150] sm:$0xff]  ;;  %v1660_v23 = vpack.c.bf16 %v438_v16, %v434_v15  ;;  %v437_v24 = vld [vmem:[%s2596_s12 + $0x220] sm:$0xff]  ;;  %v420_v25 = vld [vmem:[%s2596_s12 + $0x198] sm:$0xff] }
  0xc5   : > { %v415_v22 = vld [vmem:[%s2596_s12 + $0x170] sm:$0xff]  ;;  %v424_v26 = vld [vmem:[%s2596_s12 + $0x1b8] sm:$0xff]  ;;  %v442_v27 = vld [vmem:[%s2596_s12 + $0x248] sm:$0xff]  ;;  %v1662_v31 = vpack.c.bf16 %v437_v24, %v433_v19 }
  0xc6   : > { %1647 = vmatpush1.bf16.msra.mxu0 %v1646_v44  ;;  %v446_v28 = vld [vmem:[%s2596_s12 + $0x268] sm:$0xff]  ;;  %v441_v29 = vld [vmem:[%s2596_s12 + $0x240] sm:$0xff]  ;;  %v1714_v30 = vpack.c.bf16 %v415_v22, %v411_v21  ;;  %v1716_v33 = vpack.c.bf16 %v424_v26, %v420_v25  ;;  %v419_v34 = vld [vmem:[%s2596_s12 + $0x190] sm:$0xff] }
  0xc7   : > { %1649 = vmatprep.subr.bf16.mxu0 %v1648_v48  ;;  %1711 = vmatpush1.bf16.msra.mxu1 %v1710_v17  ;;  %v445_v32 = vld [vmem:[%s2596_s12 + $0x260] sm:$0xff]  ;;  %v423_v35 = vld [vmem:[%s2596_s12 + $0x1b0] sm:$0xff]  ;;  %v1664_v36 = vpack.c.bf16 %v446_v28, %v442_v27  ;;  %v428_v37 = vld [vmem:[%s2596_s12 + $0x1d8] sm:$0xff] }
  0xc8   : > { %1713 = vmatprep.subr.bf16.mxu1 %v1712_v20  ;;  %v432_v38 = vld [vmem:[%s2596_s12 + $0x1f8] sm:$0xff]  ;;  %v338_v39 = vld [vmem:[%s2588_s30 + $0x8] sm:$0xff]  ;;  %v1718_v42 = vpack.c.bf16 %v423_v35, %v419_v34  ;;  %v1666_v43 = vpack.c.bf16 %v445_v32, %v441_v29  ;;  %v449_v44 = vld [vmem:[%s2596_s12 + $0x280] sm:$0xff] }
  0xc9   : > { %v450_v40 = vld [vmem:[%s2596_s12 + $0x288] sm:$0xff]  ;;  %561 = vmatprep.mubr.f32.mxu0 %v338_v39  ;;  %722 = vmatprep.mubr.f32.mxu1 %v338_v39  ;;  %v1720_v45 = vpack.c.bf16 %v432_v38, %v428_v37  ;;  %v427_v46 = vld [vmem:[%s2596_s12 + $0x1d0] sm:$0xff]  ;;  %v453_v49 = vld [vmem:[%s2596_s12 + $0x2a0] sm:$0xff] }
  0xca   : > { %1651 = vmatpush1.bf16.msra.mxu0 %v1650_v58  ;;  %v454_v41 = vld [vmem:[%s2596_s12 + $0x2a8] sm:$0xff]  ;;  %v431_v47 = vld [vmem:[%s2596_s12 + $0x1f0] sm:$0xff]  ;;  %v436_v50 = vld [vmem:[%s2596_s12 + $0x218] sm:$0xff]  ;;  %v1670_v55 = vpack.c.bf16 %v453_v49, %v449_v44 }
  0xcb   : > { %1653 = vmatprep.subr.bf16.mxu0 %v1652_v63  ;;  %1715 = vmatpush1.bf16.msra.mxu1 %v1714_v30  ;;  %v1668_v48 = vpack.c.bf16 %v454_v41, %v450_v40  ;;  %v440_v51 = vld [vmem:[%s2596_s12 + $0x238] sm:$0xff]  ;;  %v458_v52 = vld [vmem:[%s2596_s12 + $0x2c8] sm:$0xff]  ;;  %v1722_v54 = vpack.c.bf16 %v431_v47, %v427_v46  ;;  %v457_v56 = vld [vmem:[%s2596_s12 + $0x2c0] sm:$0xff] }
  0xcc   : > { %1717 = vmatprep.subr.bf16.mxu1 %v1716_v33  ;;  %v462_v53 = vld [vmem:[%s2596_s12 + $0x2e8] sm:$0xff]  ;;  %v1724_v57 = vpack.c.bf16 %v440_v51, %v436_v50  ;;  %v435_v58 = vld [vmem:[%s2596_s12 + $0x210] sm:$0xff]  ;;  %v461_v61 = vld [vmem:[%s2596_s12 + $0x2e0] sm:$0xff] }
  0xcd   : > { %v439_v59 = vld [vmem:[%s2596_s12 + $0x230] sm:$0xff]  ;;  %v1672_v60 = vpack.c.bf16 %v462_v53, %v458_v52  ;;  %v444_v62 = vld [vmem:[%s2596_s12 + $0x258] sm:$0xff]  ;;  %v466_v0 = vld [vmem:[%s2596_s12 + $0x308] sm:$0xff]  ;;  %v1674_v3 = vpack.c.bf16 %v461_v61, %v457_v56 }
  0xce   : > { %1655 = vmatpush1.bf16.msra.mxu0 %v1654_v6  ;;  %v448_v63 = vld [vmem:[%s2596_s12 + $0x278] sm:$0xff]  ;;  %v470_v1 = vld [vmem:[%s2596_s12 + $0x328] sm:$0xff]  ;;  %v1726_v2 = vpack.c.bf16 %v439_v59, %v435_v58  ;;  %v465_v4 = vld [vmem:[%s2596_s12 + $0x300] sm:$0xff] }
  0xcf   : > { %1657 = vmatprep.subr.bf16.mxu0 %v1656_v11  ;;  %1719 = vmatpush1.bf16.msra.mxu1 %v1718_v42  ;;  %v1728_v5 = vpack.c.bf16 %v448_v63, %v444_v62  ;;  %v443_v6 = vld [vmem:[%s2596_s12 + $0x250] sm:$0xff]  ;;  %v1676_v8 = vpack.c.bf16 %v470_v1, %v466_v0  ;;  %v469_v9 = vld [vmem:[%s2596_s12 + $0x320] sm:$0xff]  ;;  %v452_v10 = vld [vmem:[%s2596_s12 + $0x298] sm:$0xff] }
  0xd0   : > { %1721 = vmatprep.subr.bf16.mxu1 %v1720_v45  ;;  %v447_v7 = vld [vmem:[%s2596_s12 + $0x270] sm:$0xff]  ;;  %v456_v11 = vld [vmem:[%s2596_s12 + $0x2b8] sm:$0xff]  ;;  %v474_v12 = vld [vmem:[%s2596_s12 + $0x348] sm:$0xff]  ;;  %v1678_v15 = vpack.c.bf16 %v469_v9, %v465_v4 }
  0xd1   : > { %v478_v13 = vld [vmem:[%s2596_s12 + $0x368] sm:$0xff]  ;;  %v1730_v14 = vpack.c.bf16 %v447_v7, %v443_v6  ;;  %v473_v16 = vld [vmem:[%s2596_s12 + $0x340] sm:$0xff]  ;;  %v1732_v17 = vpack.c.bf16 %v456_v11, %v452_v10  ;;  %v455_v19 = vld [vmem:[%s2596_s12 + $0x2b0] sm:$0xff] }
  0xd2   : > { %1659 = vmatpush1.bf16.msra.mxu0 %v1658_v18  ;;  %v451_v18 = vld [vmem:[%s2596_s12 + $0x290] sm:$0xff]  ;;  %v1680_v20 = vpack.c.bf16 %v478_v13, %v474_v12  ;;  %v477_v21 = vld [vmem:[%s2596_s12 + $0x360] sm:$0xff]  ;;  %v460_v22 = vld [vmem:[%s2596_s12 + $0x2d8] sm:$0xff] }
  0xd3   : > { %1661 = vmatprep.subr.bf16.mxu0 %v1660_v23  ;;  %1723 = vmatpush1.bf16.msra.mxu1 %v1722_v54  ;;  %v464_v23 = vld [vmem:[%s2596_s12 + $0x2f8] sm:$0xff]  ;;  %v482_v24 = vld [vmem:[%s2596_s12 + $0x388] sm:$0xff]  ;;  %v1734_v26 = vpack.c.bf16 %v455_v19, %v451_v18  ;;  %v1682_v27 = vpack.c.bf16 %v477_v21, %v473_v16  ;;  %v481_v28 = vld [vmem:[%s2596_s12 + $0x380] sm:$0xff] }
  0xd4   : > { %1725 = vmatprep.subr.bf16.mxu1 %v1724_v57  ;;  %v486_v25 = vld [vmem:[%s2596_s12 + $0x3a8] sm:$0xff]  ;;  %v1736_v29 = vpack.c.bf16 %v464_v23, %v460_v22  ;;  %v459_v30 = vld [vmem:[%s2596_s12 + $0x2d0] sm:$0xff]  ;;  %v485_v33 = vld [vmem:[%s2596_s12 + $0x3a0] sm:$0xff] }
  0xd5   : > { %v1684_v32 = vpack.c.bf16 %v486_v25, %v482_v24  ;;  %v468_v34 = vld [vmem:[%s2596_s12 + $0x318] sm:$0xff]  ;;  %v494_v37 = vld [vmem:[%s2596_s12 + $0x3e8] sm:$0xff]  ;;  %v1686_v39 = vpack.c.bf16 %v485_v33, %v481_v28  ;;  %v489_v40 = vld [vmem:[%s2596_s12 + $0x3c0] sm:$0xff] }
  0xd6   : > { %1663 = vmatpush1.bf16.msra.mxu0 %v1662_v31  ;;  %v463_v31 = vld [vmem:[%s2596_s12 + $0x2f0] sm:$0xff]  ;;  %v472_v35 = vld [vmem:[%s2596_s12 + $0x338] sm:$0xff]  ;;  %v493_v45 = vld [vmem:[%s2596_s12 + $0x3e0] sm:$0xff] }
  0xd7   : > { %1665 = vmatprep.subr.bf16.mxu0 %v1664_v36  ;;  %1727 = vmatpush1.bf16.msra.mxu1 %v1726_v2  ;;  %v490_v36 = vld [vmem:[%s2596_s12 + $0x3c8] sm:$0xff]  ;;  %v1738_v38 = vpack.c.bf16 %v463_v31, %v459_v30  ;;  %v1740_v41 = vpack.c.bf16 %v472_v35, %v468_v34  ;;  %v467_v42 = vld [vmem:[%s2596_s12 + $0x310] sm:$0xff]  ;;  %v476_v46 = vld [vmem:[%s2596_s12 + $0x358] sm:$0xff]  ;;  %v1690_v51 = vpack.c.bf16 %v493_v45, %v489_v40 }
  0xd8   : > { %1729 = vmatprep.subr.bf16.mxu1 %v1728_v5  ;;  %v1688_v44 = vpack.c.bf16 %v494_v37, %v490_v36  ;;  %v480_v47 = vld [vmem:[%s2596_s12 + $0x378] sm:$0xff]  ;;  %v475_v53 = vld [vmem:[%s2596_s12 + $0x350] sm:$0xff]  ;;  %v1075_v58 = vld [vmem:[%s2602_s25] sm:$0xff] }
  0xd9   : > { %v1078_v49 = vld [vmem:[%s2602_s25 + $0x18] sm:$0xff]  ;;  %v1744_v52 = vpack.c.bf16 %v480_v47, %v476_v46  ;;  %v479_v54 = vld [vmem:[%s2596_s12 + $0x370] sm:$0xff]  ;;  %v1080_v61 = vld [vmem:[%s2602_s25 + $0x28] sm:$0xff] }
  0xda   : > { %1667 = vmatpush1.bf16.msra.mxu0 %v1666_v43  ;;  %v471_v43 = vld [vmem:[%s2596_s12 + $0x330] sm:$0xff]  ;;  %v488_v56 = vld [vmem:[%s2596_s12 + $0x3b8] sm:$0xff]  ;;  %v337_v63 = vld [vmem:[%s2588_s30] sm:$0xff] }
  0xdb   : > { %1669 = vmatprep.subr.bf16.mxu0 %v1668_v48  ;;  %1731 = vmatpush1.bf16.msra.mxu1 %v1730_v14  ;;  %v1076_v48 = vld [vmem:[%s2602_s25 + $0x8] sm:$0xff]  ;;  %v1742_v50 = vpack.c.bf16 %v471_v43, %v467_v42  ;;  %v1077_v59 = vld [vmem:[%s2602_s25 + $0x10] sm:$0xff]  ;;  %v1082_v62 = vld [vmem:[%s2602_s25 + $0x38] sm:$0xff] }
  0xdc   : > { %1733 = vmatprep.subr.bf16.mxu1 %v1732_v17  ;;  %v1756_v57 = vpack.c.bf16 %v1078_v49, %v1076_v48  ;;  %v483_v1 = vld [vmem:[%s2596_s12 + $0x390] sm:$0xff]  ;;  %v492_v4 = vld [vmem:[%s2596_s12 + $0x3d8] sm:$0xff]  ;;  %v1758_v6 = vpack.c.bf16 %v1077_v59, %v1075_v58  ;;  %v1760_v7 = vpack.c.bf16 %v1082_v62, %v1080_v61  ;;  %v1084_v11 = vld [vmem:[%s2602_s25 + $0x48] sm:$0xff] }
  0xdd   : > { %v487_v2 = vld [vmem:[%s2596_s12 + $0x3b0] sm:$0xff]  ;;  %v496_v5 = vld [vmem:[%s2596_s12 + $0x3f8] sm:$0xff]  ;;  %v342_v17 = vld [vmem:[%s2588_s30 + $0x28] sm:$0xff] }
  0xde   : > { %1671 = vmatpush1.bf16.msra.mxu0 %v1670_v55  ;;  %v484_v55 = vld [vmem:[%s2596_s12 + $0x398] sm:$0xff]  ;;  %v1081_v9 = vld [vmem:[%s2602_s25 + $0x30] sm:$0xff]  ;;  %v1750_v10 = vpack.c.bf16 %v487_v2, %v483_v1  ;;  %v1752_v14 = vpack.c.bf16 %v496_v5, %v492_v4  ;;  %v1088_v23 = vld [vmem:[%s2602_s25 + $0x68] sm:$0xff] }
  0xdf   : > { %1673 = vmatprep.subr.bf16.mxu0 %v1672_v60  ;;  %1735 = vmatpush1.bf16.msra.mxu1 %v1734_v26  ;;  %v1746_v60 = vpack.c.bf16 %v479_v54, %v475_v53  ;;  %v1748_v0 = vpack.c.bf16 %v488_v56, %v484_v55  ;;  %v1086_v12 = vld [vmem:[%s2602_s25 + $0x58] sm:$0xff]  ;;  %v339_v13 = vld [vmem:[%s2588_s30 + $0x10] sm:$0xff]  ;;  %v341_v25 = vld [vmem:[%s2588_s30 + $0x20] sm:$0xff] }
  0xe0   : > { %1737 = vmatprep.subr.bf16.mxu1 %v1736_v29  ;;  %v495_v16 = vld [vmem:[%s2596_s12 + $0x3f0] sm:$0xff]  ;;  %v1764_v19 = vpack.c.bf16 %v1086_v12, %v1084_v11  ;;  %v1090_v24 = vld [vmem:[%s2602_s25 + $0x78] sm:$0xff]  ;;  %v1087_v29 = vld [vmem:[%s2602_s25 + $0x60] sm:$0xff] }
  0xe1   : > { %v1085_v21 = vld [vmem:[%s2602_s25 + $0x50] sm:$0xff]  ;;  %v344_v26 = vld [vmem:[%s2588_s30 + $0x38] sm:$0xff]  ;;  %v1768_v28 = vpack.c.bf16 %v1090_v24, %v1088_v23  ;;  %v1092_v31 = vld [vmem:[%s2602_s25 + $0x88] sm:$0xff] }
  0xe2   : > { %1675 = vmatpush1.bf16.msra.mxu0 %v1674_v3  ;;  %v340_v3 = vld [vmem:[%s2588_s30 + $0x18] sm:$0xff]  ;;  %v1089_v30 = vld [vmem:[%s2602_s25 + $0x70] sm:$0xff]  ;;  %v346_v34 = vld [vmem:[%s2588_s30 + $0x48] sm:$0xff] }
  0xe3   : > { %1677 = vmatprep.subr.bf16.mxu0 %v1676_v8  ;;  %1739 = vmatpush1.bf16.msra.mxu1 %v1738_v38  ;;  %v1079_v8 = vld [vmem:[%s2602_s25 + $0x20] sm:$0xff]  ;;  %v343_v33 = vld [vmem:[%s2588_s30 + $0x30] sm:$0xff]  ;;  %v1770_v35 = vpack.c.bf16 %v1089_v30, %v1087_v29  ;;  %v1098_v40 = vld [vmem:[%s2602_s25 + $0xb8] sm:$0xff] }
  0xe4   : > { %1741 = vmatprep.subr.bf16.mxu1 %v1740_v41  ;;  %v1762_v18 = vpack.c.bf16 %v1081_v9, %v1079_v8  ;;  %v1091_v37 = vld [vmem:[%s2602_s25 + $0x80] sm:$0xff]  ;;  %v1093_v38 = vld [vmem:[%s2602_s25 + $0x90] sm:$0xff]  ;;  %v348_v42 = vld [vmem:[%s2588_s30 + $0x58] sm:$0xff] }
  0xe5   : > { %v345_v41 = vld [vmem:[%s2588_s30 + $0x40] sm:$0xff]  ;;  %v1774_v43 = vpack.c.bf16 %v1093_v38, %v1091_v37  ;;  %v1097_v46 = vld [vmem:[%s2602_s25 + $0xb0] sm:$0xff]  ;;  %v1100_v47 = vld [vmem:[%s2602_s25 + $0xc8] sm:$0xff] }
  0xe6   : > { %1679 = vmatpush1.bf16.msra.mxu0 %v1678_v15  ;;  %v491_v15 = vld [vmem:[%s2596_s12 + $0x3d0] sm:$0xff]  ;;  %v1095_v45 = vld [vmem:[%s2602_s25 + $0xa0] sm:$0xff]  ;;  %v1102_v48 = vld [vmem:[%s2602_s25 + $0xd8] sm:$0xff] }
  0xe7   : > { %1681 = vmatprep.subr.bf16.mxu0 %v1680_v20  ;;  %1743 = vmatpush1.bf16.msra.mxu1 %v1742_v50  ;;  %v1083_v20 = vld [vmem:[%s2602_s25 + $0x40] sm:$0xff]  ;;  %v1754_v22 = vpack.c.bf16 %v495_v16, %v491_v15  ;;  %v347_v49 = vld [vmem:[%s2588_s30 + $0x50] sm:$0xff]  ;;  %v350_v50 = vld [vmem:[%s2588_s30 + $0x68] sm:$0xff] }
  0xe8   : > { %1745 = vmatprep.subr.bf16.mxu1 %v1744_v52  ;;  %v1780_v52 = vpack.c.bf16 %v1102_v48, %v1100_v47  ;;  %v1099_v53 = vld [vmem:[%s2602_s25 + $0xc0] sm:$0xff]  ;;  %v1101_v54 = vld [vmem:[%s2602_s25 + $0xd0] sm:$0xff]  ;;  %v1104_v55 = vld [vmem:[%s2602_s25 + $0xe8] sm:$0xff] }
  0xe9   : > { %v1106_v56 = vld [vmem:[%s2602_s25 + $0xf8] sm:$0xff]  ;;  %v1782_v59 = vpack.c.bf16 %v1101_v54, %v1099_v53  ;;  %v351_v61 = vld [vmem:[%s2588_s30 + $0x70] sm:$0xff]  ;;  %v354_v62 = vld [vmem:[%s2588_s30 + $0x88] sm:$0xff] }
  0xea   : > { %1683 = vmatpush1.bf16.msra.mxu0 %v1682_v27  ;;  %v1766_v27 = vpack.c.bf16 %v1085_v21, %v1083_v20  ;;  %v352_v58 = vld [vmem:[%s2588_s30 + $0x78] sm:$0xff]  ;;  %v355_v1 = vld [vmem:[%s2588_s30 + $0x90] sm:$0xff]  ;;  %v358_v2 = vld [vmem:[%s2588_s30 + $0xa8] sm:$0xff] }
  0xeb   : > { %1685 = vmatprep.subr.bf16.mxu0 %v1684_v32  ;;  %1747 = vmatpush1.bf16.msra.mxu1 %v1746_v60  ;;  %v1094_v32 = vld [vmem:[%s2602_s25 + $0x98] sm:$0xff]  ;;  %v1784_v60 = vpack.c.bf16 %v1106_v56, %v1104_v55  ;;  %v359_v5 = vld [vmem:[%s2588_s30 + $0xb0] sm:$0xff]  ;;  %v365_v11 = vld [vmem:[%s2588_s30 + $0xe0] sm:$0xff] }
  0xec   : > { %1749 = vmatprep.subr.bf16.mxu1 %v1748_v0  ;;  %v1772_v36 = vpack.c.bf16 %v1094_v32, %v1092_v31  ;;  %v356_v0 = vld [vmem:[%s2588_s30 + $0x98] sm:$0xff]  ;;  %v363_v9 = vld [vmem:[%s2588_s30 + $0xd0] sm:$0xff]  ;;  %v1107_v20 = vld [vmem:[%s2602_s25 + $0x100] sm:$0xff] }
  0xed   : > { %v360_v4 = vld [vmem:[%s2588_s30 + $0xb8] sm:$0xff]  ;;  %v1105_v15 = vld [vmem:[%s2602_s25 + $0xf0] sm:$0xff]  ;;  %v1112_v23 = vld [vmem:[%s2602_s25 + $0x128] sm:$0xff] }
  0xee   : > { %1687 = vmatpush1.bf16.msra.mxu0 %v1686_v39  ;;  %v1096_v39 = vld [vmem:[%s2602_s25 + $0xa8] sm:$0xff]  ;;  %v364_v8 = vld [vmem:[%s2588_s30 + $0xd8] sm:$0xff]  ;;  %v1109_v21 = vld [vmem:[%s2602_s25 + $0x110] sm:$0xff] }
  0xef   : > { %1689 = vmatprep.subr.bf16.mxu0 %v1688_v44  ;;  %1751 = vmatpush1.bf16.msra.mxu1 %v1750_v10  ;;  %v1776_v44 = vpack.c.bf16 %v1098_v40, %v1096_v39  ;;  %v366_v10 = vld [vmem:[%s2588_s30 + $0xe8] sm:$0xff]  ;;  %v368_v12 = vld [vmem:[%s2588_s30 + $0xf8] sm:$0xff]  ;;  %v1115_v32 = vld [vmem:[%s2602_s25 + $0x140] sm:$0xff] }
  0xf0   : > { %1753 = vmatprep.subr.bf16.mxu1 %v1752_v14  ;;  %v1103_v14 = vld [vmem:[%s2602_s25 + $0xe0] sm:$0xff]  ;;  %v1114_v24 = vld [vmem:[%s2602_s25 + $0x138] sm:$0xff]  ;;  %v1116_v29 = vld [vmem:[%s2602_s25 + $0x148] sm:$0xff] }
  0xf1   : > { %v1786_v16 = vpack.c.bf16 %v1105_v15, %v1103_v14  ;;  %v1118_v30 = vld [vmem:[%s2602_s25 + $0x158] sm:$0xff]  ;;  %v1119_v38 = vld [vmem:[%s2602_s25 + $0x160] sm:$0xff]  ;;  %v1121_v39 = vld [vmem:[%s2602_s25 + $0x170] sm:$0xff] }
  0xf2   : > { %1691 = vmatpush1.bf16.msra.mxu0 %v1690_v51  ;;  %v1778_v51 = vpack.c.bf16 %v1097_v46, %v1095_v45  ;;  %v1796_v31 = vpack.c.bf16 %v1118_v30, %v1116_v29  ;;  %v1802_v40 = vpack.c.bf16 %v1121_v39, %v1119_v38  ;;  %v1125_v45 = vld [vmem:[%s2602_s25 + $0x190] sm:$0xff]  ;;  %v1128_v47 = vld [vmem:[%s2602_s25 + $0x1a8] sm:$0xff]  ;;  %v1130_v48 = vld [vmem:[%s2602_s25 + $0x1b8] sm:$0xff] }
  0xf3   : > { %1757 = vmatprep.subr.bf16.mxu0 %v1756_v57  ;;  %1755 = vmatpush1.bf16.msra.mxu1 %v1754_v22  ;;  %v1790_v22 = vpack.c.bf16 %v1109_v21, %v1107_v20  ;;  %v1132_v53 = vld [vmem:[%s2602_s25 + $0x1c8] sm:$0xff]  ;;  %v1134_v54 = vld [vmem:[%s2602_s25 + $0x1d8] sm:$0xff]  ;;  %v1131_v56 = vld [vmem:[%s2602_s25 + $0x1c0] sm:$0xff] }
  0xf4   : > { %1820 = vmatprep.subr.bf16.mxu1 %v1756_v57  ;;  %v349_v57 = vld [vmem:[%s2588_s30 + $0x60] sm:$0xff]  ;;  %v1812_v55 = vpack.c.bf16 %v1134_v54, %v1132_v53 }
  0xf5   : > { %562 = vmatmul.mubr.f32.vlgmr.msra.gmra.mrb[0].mxu0 %v337_v63 }
  0xf6   : > { %567 = vmatprep.mubr.f32.mxu0 %v340_v3  ;;  %1759 = vmatpush1.bf16.msra.mxu0 %v1758_v6 }
  0xf7   : > { %1761 = vmatprep.subr.bf16.mxu0 %v1760_v7  ;;  %723 = vmatmul.mubr.f32.vlgmr.msra.gmra.mrb[0].mxu1 %v337_v63  ;;  %v353_v63 = vld [vmem:[%s2588_s30 + $0x80] sm:$0xff] }
  0xf8   : > { %728 = vmatprep.mubr.f32.mxu1 %v340_v3  ;;  %1836 = vmatpush1.bf16.msra.mxu1 %v1758_v6  ;;  %v357_v3 = vld [vmem:[%s2588_s30 + $0xa0] sm:$0xff]  ;;  %v362_v6 = vld [vmem:[%s2588_s30 + $0xc8] sm:$0xff] }
  0xf9   : > { %568 = vmatmul.mubr.f32.gmra.mrb[2].mxu0 %v339_v13  ;;  %1821 = vmatprep.subr.bf16.mxu1 %v1760_v7  ;;  %v361_v7 = vld [vmem:[%s2588_s30 + $0xc0] sm:$0xff] }
  0xfa   : > { %573 = vmatprep.mubr.f32.mxu0 %v342_v17  ;;  %1763 = vmatpush1.bf16.msra.mxu0 %v1762_v18 }
  0xfb   : > { %1765 = vmatprep.subr.bf16.mxu0 %v1764_v19  ;;  %729 = vmatmul.mubr.f32.gmra.mrb[2].mxu1 %v339_v13  ;;  %v367_v13 = vld [vmem:[%s2588_s30 + $0xf0] sm:$0xff] }
  0xfc   : > { %734 = vmatprep.mubr.f32.mxu1 %v342_v17  ;;  %1837 = vmatpush1.bf16.msra.mxu1 %v1762_v18  ;;  %v1108_v17 = vld [vmem:[%s2602_s25 + $0x108] sm:$0xff]  ;;  %v1110_v18 = vld [vmem:[%s2602_s25 + $0x118] sm:$0xff] }
  0xfd   : > { %574 = vmatmul.mubr.f32.gmra.mrb[4].mxu0 %v341_v25  ;;  %1822 = vmatprep.subr.bf16.mxu1 %v1764_v19  ;;  %v1788_v19 = vpack.c.bf16 %v1110_v18, %v1108_v17 }
  0xfe   : > { %579 = vmatprep.mubr.f32.mxu0 %v344_v26  ;;  %1767 = vmatpush1.bf16.msra.mxu0 %v1766_v27 }
  0xff   : > { %1769 = vmatprep.subr.bf16.mxu0 %v1768_v28  ;;  %735 = vmatmul.mubr.f32.gmra.mrb[4].mxu1 %v341_v25  ;;  %v1792_v25 = vpack.c.bf16 %v1114_v24, %v1112_v23 }
 0x100   : > { %740 = vmatprep.mubr.f32.mxu1 %v344_v26  ;;  %1838 = vmatpush1.bf16.msra.mxu1 %v1766_v27  ;;  %v1111_v26 = vld [vmem:[%s2602_s25 + $0x120] sm:$0xff]  ;;  %v1113_v27 = vld [vmem:[%s2602_s25 + $0x130] sm:$0xff] }
 0x101   : > { %580 = vmatmul.mubr.f32.gmra.mrb[6].mxu0 %v343_v33  ;;  %1823 = vmatprep.subr.bf16.mxu1 %v1768_v28  ;;  %v1794_v28 = vpack.c.bf16 %v1113_v27, %v1111_v26 }
 0x102   : > { %585 = vmatprep.mubr.f32.mxu0 %v346_v34  ;;  %1771 = vmatpush1.bf16.msra.mxu0 %v1770_v35 }
 0x103   : > { %1773 = vmatprep.subr.bf16.mxu0 %v1772_v36  ;;  %741 = vmatmul.mubr.f32.gmra.mrb[6].mxu1 %v343_v33  ;;  %v1117_v33 = vld [vmem:[%s2602_s25 + $0x150] sm:$0xff] }
 0x104   : > { %746 = vmatprep.mubr.f32.mxu1 %v346_v34  ;;  %1839 = vmatpush1.bf16.msra.mxu1 %v1770_v35  ;;  %v1798_v34 = vpack.c.bf16 %v1117_v33, %v1115_v32  ;;  %v1120_v35 = vld [vmem:[%s2602_s25 + $0x168] sm:$0xff] }
 0x105   : > { %586 = vmatmul.mubr.f32.gmra.mrb[8].mxu0 %v345_v41  ;;  %1824 = vmatprep.subr.bf16.mxu1 %v1772_v36  ;;  %v1122_v36 = vld [vmem:[%s2602_s25 + $0x178] sm:$0xff] }
 0x106   : > { %591 = vmatprep.mubr.f32.mxu0 %v348_v42  ;;  %1775 = vmatpush1.bf16.msra.mxu0 %v1774_v43  ;;  %v1800_v37 = vpack.c.bf16 %v1122_v36, %v1120_v35 }
 0x107   : > { %1777 = vmatprep.subr.bf16.mxu0 %v1776_v44  ;;  %747 = vmatmul.mubr.f32.gmra.mrb[8].mxu1 %v345_v41  ;;  %v1124_v41 = vld [vmem:[%s2602_s25 + $0x188] sm:$0xff] }
 0x108   : > { %752 = vmatprep.mubr.f32.mxu1 %v348_v42  ;;  %1840 = vmatpush1.bf16.msra.mxu1 %v1774_v43  ;;  %v1126_v42 = vld [vmem:[%s2602_s25 + $0x198] sm:$0xff] }
 0x109   : > { %592 = vmatmul.mubr.f32.gmra.mrb[10].mxu0 %v347_v49  ;;  %1825 = vmatprep.subr.bf16.mxu1 %v1776_v44  ;;  %v1804_v43 = vpack.c.bf16 %v1126_v42, %v1124_v41  ;;  %v1123_v44 = vld [vmem:[%s2602_s25 + $0x180] sm:$0xff] }
 0x10a   : > { %597 = vmatprep.mubr.f32.mxu0 %v350_v50  ;;  %1779 = vmatpush1.bf16.msra.mxu0 %v1778_v51  ;;  %v1806_v46 = vpack.c.bf16 %v1125_v45, %v1123_v44 }
 0x10b   : > { %1781 = vmatprep.subr.bf16.mxu0 %v1780_v52  ;;  %753 = vmatmul.mubr.f32.gmra.mrb[10].mxu1 %v347_v49  ;;  %v1808_v49 = vpack.c.bf16 %v1130_v48, %v1128_v47 }
 0x10c   : > { %758 = vmatprep.mubr.f32.mxu1 %v350_v50  ;;  %1841 = vmatpush1.bf16.msra.mxu1 %v1778_v51  ;;  %v1127_v50 = vld [vmem:[%s2602_s25 + $0x1a0] sm:$0xff]  ;;  %v1129_v51 = vld [vmem:[%s2602_s25 + $0x1b0] sm:$0xff] }
 0x10d   : > { %598 = vmatmul.mubr.f32.gmra.mrb[12].mxu0 %v349_v57  ;;  %1826 = vmatprep.subr.bf16.mxu1 %v1780_v52  ;;  %v1810_v52 = vpack.c.bf16 %v1129_v51, %v1127_v50 }
 0x10e   : > { %603 = vmatprep.mubr.f32.mxu0 %v352_v58  ;;  %1783 = vmatpush1.bf16.msra.mxu0 %v1782_v59 }
 0x10f   : > { %1785 = vmatprep.subr.bf16.mxu0 %v1784_v60  ;;  %759 = vmatmul.mubr.f32.gmra.mrb[12].mxu1 %v349_v57  ;;  %v1133_v57 = vld [vmem:[%s2602_s25 + $0x1d0] sm:$0xff] }
 0x110   : > { %764 = vmatprep.mubr.f32.mxu1 %v352_v58  ;;  %1842 = vmatpush1.bf16.msra.mxu1 %v1782_v59  ;;  %v1814_v58 = vpack.c.bf16 %v1133_v57, %v1131_v56  ;;  %v1136_v59 = vld [vmem:[%s2602_s25 + $0x1e8] sm:$0xff] }
 0x111   : > { %604 = vmatmul.mubr.f32.gmra.mrb[14].mxu0 %v351_v61  ;;  %1827 = vmatprep.subr.bf16.mxu1 %v1784_v60  ;;  %v1138_v60 = vld [vmem:[%s2602_s25 + $0x1f8] sm:$0xff] }
 0x112   : > { %609 = vmatprep.mubr.f32.mxu0 %v354_v62  ;;  %1787 = vmatpush1.bf16.msra.mxu0 %v1786_v16 }
 0x113   : > { %765 = vmatmul.mubr.f32.gmra.mrb[14].mxu1 %v351_v61  ;;  %1789 = vmatprep.subr.bf16.mxu0 %v1788_v19  ;;  %v1816_v61 = vpack.c.bf16 %v1138_v60, %v1136_v59 }
 0x114   : > { %770 = vmatprep.mubr.f32.mxu1 %v354_v62  ;;  %1843 = vmatpush1.bf16.msra.mxu1 %v1786_v16  ;;  %v1135_v62 = vld [vmem:[%s2602_s25 + $0x1e0] sm:$0xff] }
 0x115   : > { %610 = vmatmul.mubr.f32.gmra.mrb[16].mxu0 %v353_v63  ;;  %1828 = vmatprep.subr.bf16.mxu1 %v1788_v19 }
 0x116   : > { %615 = vmatprep.mubr.f32.mxu0 %v356_v0  ;;  %1791 = vmatpush1.bf16.msra.mxu0 %v1790_v22 }
 0x117   : > { %771 = vmatmul.mubr.f32.gmra.mrb[16].mxu1 %v353_v63  ;;  %1793 = vmatprep.subr.bf16.mxu0 %v1792_v25  ;;  %v1137_v63 = vld [vmem:[%s2602_s25 + $0x1f0] sm:$0xff] }
 0x118   : > { %776 = vmatprep.mubr.f32.mxu1 %v356_v0  ;;  %1844 = vmatpush1.bf16.msra.mxu1 %v1790_v22  ;;  %v1818_v0 = vpack.c.bf16 %v1137_v63, %v1135_v62 }
 0x119   : > { %616 = vmatmul.mubr.f32.gmra.mrb[18].mxu0 %v355_v1  ;;  %1829 = vmatprep.subr.bf16.mxu1 %v1792_v25 }
 0x11a   : > { %621 = vmatprep.mubr.f32.mxu0 %v358_v2  ;;  %1795 = vmatpush1.bf16.msra.mxu0 %v1794_v28 }
 0x11b   : > { %777 = vmatmul.mubr.f32.gmra.mrb[18].mxu1 %v355_v1  ;;  %1797 = vmatprep.subr.bf16.mxu0 %v1796_v31 }
 0x11c   : > { %782 = vmatprep.mubr.f32.mxu1 %v358_v2  ;;  %1845 = vmatpush1.bf16.msra.mxu1 %v1794_v28 }
 0x11d   : > { %622 = vmatmul.mubr.f32.gmra.mrb[20].mxu0 %v357_v3  ;;  %1830 = vmatprep.subr.bf16.mxu1 %v1796_v31 }
 0x11e   : > { %627 = vmatprep.mubr.f32.mxu0 %v360_v4  ;;  %1799 = vmatpush1.bf16.msra.mxu0 %v1798_v34 }
 0x11f   : > { %783 = vmatmul.mubr.f32.gmra.mrb[20].mxu1 %v357_v3  ;;  %1801 = vmatprep.subr.bf16.mxu0 %v1800_v37 }
 0x120   : > { %788 = vmatprep.mubr.f32.mxu1 %v360_v4  ;;  %1846 = vmatpush1.bf16.msra.mxu1 %v1798_v34 }
 0x121   : > { %628 = vmatmul.mubr.f32.gmra.mrb[22].mxu0 %v359_v5  ;;  %1831 = vmatprep.subr.bf16.mxu1 %v1800_v37 }
 0x122   : > { %633 = vmatprep.mubr.f32.mxu0 %v362_v6  ;;  %1803 = vmatpush1.bf16.msra.mxu0 %v1802_v40 }
 0x123   : > { %789 = vmatmul.mubr.f32.gmra.mrb[22].mxu1 %v359_v5  ;;  %1805 = vmatprep.subr.bf16.mxu0 %v1804_v43 }
 0x124   : > { %794 = vmatprep.mubr.f32.mxu1 %v362_v6  ;;  %1847 = vmatpush1.bf16.msra.mxu1 %v1802_v40 }
 0x125   : > { %634 = vmatmul.mubr.f32.gmra.mrb[24].mxu0 %v361_v7  ;;  %1832 = vmatprep.subr.bf16.mxu1 %v1804_v43 }
 0x126   : > { %639 = vmatprep.mubr.f32.mxu0 %v364_v8  ;;  %1807 = vmatpush1.bf16.msra.mxu0 %v1806_v46 }
 0x127   : > { %795 = vmatmul.mubr.f32.gmra.mrb[24].mxu1 %v361_v7  ;;  %1809 = vmatprep.subr.bf16.mxu0 %v1808_v49 }
 0x128   : > { %800 = vmatprep.mubr.f32.mxu1 %v364_v8  ;;  %1848 = vmatpush1.bf16.msra.mxu1 %v1806_v46 }
 0x129   : > { %640 = vmatmul.mubr.f32.gmra.mrb[26].mxu0 %v363_v9  ;;  %1833 = vmatprep.subr.bf16.mxu1 %v1808_v49 }
 0x12a   : > { %645 = vmatprep.mubr.f32.mxu0 %v366_v10  ;;  %1811 = vmatpush1.bf16.msra.mxu0 %v1810_v52 }
 0x12b   : > { %801 = vmatmul.mubr.f32.gmra.mrb[26].mxu1 %v363_v9  ;;  %1813 = vmatprep.subr.bf16.mxu0 %v1812_v55 }
 0x12c   : > { %806 = vmatprep.mubr.f32.mxu1 %v366_v10  ;;  %1849 = vmatpush1.bf16.msra.mxu1 %v1810_v52 }
 0x12d   : > { %646 = vmatmul.mubr.f32.gmra.mrb[28].mxu0 %v365_v11  ;;  %1834 = vmatprep.subr.bf16.mxu1 %v1812_v55 }
 0x12e   : > { %651 = vmatprep.mubr.f32.mxu0 %v368_v12  ;;  %1815 = vmatpush1.bf16.msra.mxu0 %v1814_v58 }
 0x12f   : > { %807 = vmatmul.mubr.f32.gmra.mrb[28].mxu1 %v365_v11  ;;  %1817 = vmatprep.subr.bf16.mxu0 %v1816_v61 }
 0x130   : > { %812 = vmatprep.mubr.f32.mxu1 %v368_v12  ;;  %1850 = vmatpush1.bf16.msra.mxu1 %v1814_v58 }
 0x131   : > { %652 = vmatmul.mubr.f32.gmra.mrb[30].mxu0 %v367_v13  ;;  %1835 = vmatprep.subr.bf16.mxu1 %v1816_v61 }
 0x132   : > { %1819 = vmatpush1.bf16.msra.mxu0 %v1818_v0 }
 0x133   : > { %813 = vmatmul.mubr.f32.gmra.mrb[30].mxu1 %v367_v13 }
 0x134   : > { %1851 = vmatpush1.bf16.msra.mxu1 %v1818_v0 }
 0x1c8   : > { %v2831_v1 = vpop.f32.mrb[0].mxu0 }
 0x1c9   : > { %v819_v2 = vsub.f32 0.0, %v2831_v1  ;;  %v2834_v3 = vpop.f32.mrb[1].mxu0 }
 0x1ca   : > { %v820_v4 = vsub.f32 0.0, %v2834_v3  ;;  %v2849_v18 = vpop.f32.mrb[0].mxu1 }
 0x1cb   : > { %v851_v5 = vmul.f32 1.442695, %v819_v2  ;;  %v2853_v21 = vpop.f32.mrb[1].mxu1 }
 0x1cc   : > { %v853_v6 = vmul.f32 1.442695, %v820_v4  ;;  %v2837_v7 = vpop.f32.mrb[2].mxu0 }
 0x1cd   : > { %1961 = vpow2.f32 %v851_v5  ;;  %v821_v8 = vsub.f32 0.0, %v2837_v7  ;;  %v2840_v9 = vpop.f32.mrb[3].mxu0 }
 0x1ce   : > { %1963 = vpow2.f32 %v853_v6  ;;  %v822_v10 = vsub.f32 0.0, %v2840_v9  ;;  %v2859_v27 = vpop.f32.mrb[2].mxu1 }
 0x1cf   : > { %v855_v11 = vmul.f32 1.442695, %v821_v8  ;;  %v2863_v32 = vpop.f32.mrb[3].mxu1 }
 0x1d0   : > { %v857_v12 = vmul.f32 1.442695, %v822_v10  ;;  %v2843_v13 = vpop.f32.mrb[4].mxu0 }
 0x1d1   : > { %1965 = vpow2.f32 %v855_v11  ;;  %v823_v14 = vsub.f32 0.0, %v2843_v13  ;;  %v2846_v15 = vpop.f32.mrb[5].mxu0 }
 0x1d2   : > { %1967 = vpow2.f32 %v857_v12  ;;  %v824_v16 = vsub.f32 0.0, %v2846_v15  ;;  %v2869_v39 = vpop.f32.mrb[4].mxu1 }
 0x1d3   : > { %v859_v17 = vmul.f32 1.442695, %v823_v14  ;;  %v2873_v44 = vpop.f32.mrb[5].mxu1 }
 0x1d4   : > { %v861_v19 = vmul.f32 1.442695, %v824_v16  ;;  %v2851_v20 = vpop.f32.mrb[6].mxu0 }
 0x1d5   : > { %1969 = vpow2.f32 %v859_v17  ;;  %v825_v22 = vsub.f32 0.0, %v2851_v20  ;;  %v2856_v23 = vpop.f32.mrb[7].mxu0 }
 0x1d6   : > { %1971 = vpow2.f32 %v861_v19  ;;  %v826_v24 = vsub.f32 0.0, %v2856_v23  ;;  %v2879_v51 = vpop.f32.mrb[6].mxu1 }
 0x1d7   : > { %v1962_v25 = vpop.eup %1961  ;;  %v863_v26 = vmul.f32 1.442695, %v825_v22  ;;  %v2883_v56 = vpop.f32.mrb[7].mxu1 }
 0x1d8   : > { %v1964_v28 = vpop.eup %1963  ;;  %v915_v29 = vadd.f32 1.0, %v1962_v25  ;;  %v865_v30 = vmul.f32 1.442695, %v826_v24  ;;  %v2861_v31 = vpop.f32.mrb[8].mxu0 }
 0x1d9   : > { %v916_v33 = vadd.f32 1.0, %v1964_v28  ;;  %1973 = vpow2.f32 %v863_v26  ;;  %v827_v34 = vsub.f32 0.0, %v2861_v31  ;;  %v2866_v35 = vpop.f32.mrb[9].mxu0 }
 0x1da   : > { %1975 = vrcp.f32 %v915_v29  ;;  %v828_v36 = vsub.f32 0.0, %v2866_v35  ;;  %v2889_v63 = vpop.f32.mrb[8].mxu1 }
 0x1db   : > { %v1966_v37 = vpop.eup %1965  ;;  %1977 = vrcp.f32 %v916_v33  ;;  %v867_v38 = vmul.f32 1.442695, %v827_v34  ;;  %v2893_v6 = vpop.f32.mrb[9].mxu1 }
 0x1dc   : > { %v1968_v40 = vpop.eup %1967  ;;  %v917_v41 = vadd.f32 1.0, %v1966_v37  ;;  %1979 = vpow2.f32 %v865_v30  ;;  %v869_v42 = vmul.f32 1.442695, %v828_v36  ;;  %v2871_v43 = vpop.f32.mrb[10].mxu0 }
 0x1dd   : > { %v918_v45 = vadd.f32 1.0, %v1968_v40  ;;  %1981 = vpow2.f32 %v867_v38  ;;  %v829_v46 = vsub.f32 0.0, %v2871_v43  ;;  %v2876_v47 = vpop.f32.mrb[11].mxu0 }
 0x1de   : > { %1983 = vrcp.f32 %v917_v41  ;;  %v830_v48 = vsub.f32 0.0, %v2876_v47  ;;  %v2902_v26 = vpop.f32.mrb[10].mxu1 }
 0x1df   : > { %v1970_v49 = vpop.eup %1969  ;;  %1985 = vrcp.f32 %v918_v45  ;;  %v871_v50 = vmul.f32 1.442695, %v829_v46  ;;  %v2907_v34 = vpop.f32.mrb[11].mxu1 }
 0x1e0   : > { %v1972_v52 = vpop.eup %1971  ;;  %v919_v53 = vadd.f32 1.0, %v1970_v49  ;;  %1987 = vpow2.f32 %v869_v42  ;;  %v873_v54 = vmul.f32 1.442695, %v830_v48  ;;  %v2881_v55 = vpop.f32.mrb[12].mxu0 }
 0x1e1   : > { %v920_v57 = vadd.f32 1.0, %v1972_v52  ;;  %1989 = vpow2.f32 %v871_v50  ;;  %v831_v58 = vsub.f32 0.0, %v2881_v55  ;;  %v2886_v59 = vpop.f32.mrb[13].mxu0 }
 0x1e2   : > { %1991 = vrcp.f32 %v919_v53  ;;  %v832_v60 = vsub.f32 0.0, %v2886_v59 }
 0x1e3   : > { %v1974_v61 = vpop.eup %1973  ;;  %1993 = vrcp.f32 %v920_v57  ;;  %v875_v62 = vmul.f32 1.442695, %v831_v58 }
 0x1e4   : > { %v1976_v0 = vpop.eup %1975  ;;  %v921_v2 = vadd.f32 1.0, %v1974_v61  ;;  %1995 = vpow2.f32 %v873_v54  ;;  %v877_v4 = vmul.f32 1.442695, %v832_v60  ;;  %v2891_v5 = vpop.f32.mrb[14].mxu0 }
 0x1e5   : > { %v1978_v8 = vpop.eup %1977  ;;  %v979_v10 = vmul.f32 %v1976_v0, %v2831_v1  ;;  %1997 = vpow2.f32 %v875_v62  ;;  %v833_v11 = vsub.f32 0.0, %v2891_v5  ;;  %v2897_v12 = vpop.f32.mrb[15].mxu0 }
 0x1e6   : > { %v1980_v14 = vpop.eup %1979  ;;  %v980_v16 = vmul.f32 %v1978_v8, %v2834_v3  ;;  %1999 = vrcp.f32 %v921_v2  ;;  %v834_v17 = vsub.f32 0.0, %v2897_v12 }
 0x1e7   : > { %v1982_v19 = vpop.eup %1981  ;;  %v922_v22 = vadd.f32 1.0, %v1980_v14  ;;  %2001 = vpow2.f32 %v877_v4  ;;  %v879_v24 = vmul.f32 1.442695, %v833_v11  ;;  %v1011_v25 = vmul.f32 %v979_v10, %v2849_v18 }
 0x1e8   : > { %v1984_v1 = vpop.eup %1983  ;;  %v923_v28 = vadd.f32 1.0, %v1982_v19  ;;  %v881_v29 = vmul.f32 1.442695, %v834_v17  ;;  %v1012_v30 = vmul.f32 %v980_v16, %v2853_v21  ;;  %v2905_v33 = vpop.f32.mrb[16].mxu0 }
 0x1e9   : > { %v1986_v3 = vpop.eup %1985  ;;  %v981_v36 = vmul.f32 %v1984_v1, %v2837_v7  ;;  %2003 = vrcp.f32 %v922_v22  ;;  %v835_v37 = vsub.f32 0.0, %v2905_v33  ;;  %v2911_v38 = vpop.f32.mrb[17].mxu0 }
 0x1ea   : > { %v1988_v18 = vpop.eup %1987  ;;  %v982_v40 = vmul.f32 %v1986_v3, %v2840_v9  ;;  %2005 = vrcp.f32 %v923_v28  ;;  %v836_v41 = vsub.f32 0.0, %v2911_v38  ;;  %1203 = vmatprep.mubr.f32.mxu0 %v1012_v30  ;;  %v2916_v7 = vpop.f32.mrb[12].mxu1 }
 0x1eb   : > { %v1990_v21 = vpop.eup %1989  ;;  %v924_v42 = vadd.f32 1.0, %v1988_v18  ;;  %2007 = vpow2.f32 %v879_v24  ;;  %v883_v45 = vmul.f32 1.442695, %v835_v37  ;;  %v1013_v46 = vmul.f32 %v981_v36, %v2859_v27  ;;  %1204 = vmatmul.mubr.f32.vlgmr.msra.gmra.mrb[32].mxu0 %v1011_v25  ;;  %v2921_v53 = vpop.f32.mrb[13].mxu1 }
 0x1ec   : > { %v1992_v48 = vpop.eup %1991  ;;  %v925_v49 = vadd.f32 1.0, %v1990_v21  ;;  %2009 = vpow2.f32 %v881_v29  ;;  %v885_v50 = vmul.f32 1.442695, %v836_v41  ;;  %v1014_v52 = vmul.f32 %v982_v40, %v2863_v32  ;;  %v2919_v9 = vpop.f32.mrb[18].mxu0 }
 0x1ed   : > { %v1994_v54 = vpop.eup %1993  ;;  %v983_v57 = vmul.f32 %v1992_v48, %v2843_v13  ;;  %2011 = vrcp.f32 %v924_v42  ;;  %v837_v58 = vsub.f32 0.0, %v2919_v9  ;;  %v2925_v27 = vpop.f32.mrb[19].mxu0 }
 0x1ee   : > { %v1996_v60 = vpop.eup %1995  ;;  %v984_v61 = vmul.f32 %v1994_v54, %v2846_v15  ;;  %2013 = vrcp.f32 %v925_v49  ;;  %v838_v62 = vsub.f32 0.0, %v2925_v27  ;;  %1209 = vmatprep.mubr.f32.mxu0 %v1014_v52  ;;  %v2930_v13 = vpop.f32.mrb[14].mxu1 }
 0x1ef   : > { %v1998_v32 = vpop.eup %1997  ;;  %v926_v0 = vadd.f32 1.0, %v1996_v60  ;;  %2015 = vpow2.f32 %v883_v45  ;;  %v887_v2 = vmul.f32 1.442695, %v837_v58  ;;  %v1015_v4 = vmul.f32 %v983_v57, %v2869_v39  ;;  %1210 = vmatmul.mubr.f32.gmra.mrb[34].mxu0 %v1013_v46  ;;  %v2935_v15 = vpop.f32.mrb[15].mxu1 }
 0x1f0   : > { %v2000_v8 = vpop.eup %1999  ;;  %v927_v10 = vadd.f32 1.0, %v1998_v32  ;;  %2017 = vpow2.f32 %v885_v50  ;;  %v1016_v11 = vmul.f32 %v984_v61, %v2873_v44  ;;  %v2933_v14 = vpop.f32.mrb[20].mxu0  ;;  %v889_v19 = vmul.f32 1.442695, %v838_v62 }
 0x1f1   : > { %v2002_v16 = vpop.eup %2001  ;;  %v985_v17 = vmul.f32 %v2000_v8, %v2851_v20  ;;  %2019 = vrcp.f32 %v926_v0  ;;  %v839_v22 = vsub.f32 0.0, %v2933_v14  ;;  %v2939_v39 = vpop.f32.mrb[21].mxu0 }
 0x1f2   : > { %2021 = vrcp.f32 %v927_v10  ;;  %v928_v24 = vadd.f32 1.0, %v2002_v16  ;;  %v840_v25 = vsub.f32 0.0, %v2939_v39  ;;  %1215 = vmatprep.mubr.f32.mxu0 %v1016_v11  ;;  %v2943_v29 = vpop.f32.mrb[16].mxu1 }
 0x1f3   : > { %v2004_v1 = vpop.eup %2003  ;;  %2023 = vpow2.f32 %v887_v2  ;;  %v891_v44 = vmul.f32 1.442695, %v839_v22  ;;  %v1017_v28 = vmul.f32 %v985_v17, %v2879_v51  ;;  %1216 = vmatmul.mubr.f32.gmra.mrb[36].mxu0 %v1015_v4  ;;  %v2948_v37 = vpop.f32.mrb[17].mxu1 }
 0x1f4   : > { %v2006_v20 = vpop.eup %2005  ;;  %v986_v30 = vmul.f32 %v2004_v1, %v2856_v23  ;;  %2025 = vrcp.f32 %v928_v24  ;;  %v893_v3 = vmul.f32 1.442695, %v840_v25  ;;  %v2946_v36 = vpop.f32.mrb[22].mxu0 }
 0x1f5   : > { %v2008_v18 = vpop.eup %2007  ;;  %v987_v40 = vmul.f32 %v2006_v20, %v2861_v31  ;;  %2027 = vpow2.f32 %v889_v19  ;;  %v841_v41 = vsub.f32 0.0, %v2946_v36  ;;  %v2952_v21 = vpop.f32.mrb[23].mxu0 }
 0x1f6   : > { %v2010_v51 = vpop.eup %2009  ;;  %v929_v42 = vadd.f32 1.0, %v2008_v18  ;;  %2029 = vpow2.f32 %v891_v44  ;;  %v1018_v45 = vmul.f32 %v986_v30, %v2883_v56  ;;  %v842_v23 = vsub.f32 0.0, %v2952_v21  ;;  %v2957_v52 = vpop.f32.mrb[18].mxu1 }
 0x1f7   : > { %v2012_v46 = vpop.eup %2011  ;;  %v930_v48 = vadd.f32 1.0, %v2010_v51  ;;  %2031 = vpow2.f32 %v893_v3  ;;  %v895_v49 = vmul.f32 1.442695, %v841_v41  ;;  %v1019_v50 = vmul.f32 %v987_v40, %v2889_v63  ;;  %v2962_v60 = vpop.f32.mrb[19].mxu1 }
 0x1f8   : > { %v2014_v31 = vpop.eup %2013  ;;  %v988_v54 = vmul.f32 %v2012_v46, %v2866_v35  ;;  %2033 = vrcp.f32 %v929_v42  ;;  %v897_v57 = vmul.f32 1.442695, %v842_v23  ;;  %1221 = vmatprep.mubr.f32.mxu0 %v1018_v45  ;;  %v2960_v58 = vpop.f32.mrb[24].mxu0 }
 0x1f9   : > { %v2016_v56 = vpop.eup %2015  ;;  %v989_v61 = vmul.f32 %v2014_v31, %v2871_v43  ;;  %2035 = vrcp.f32 %v930_v48  ;;  %1222 = vmatmul.mubr.f32.gmra.mrb[38].mxu0 %v1017_v28  ;;  %v843_v62 = vsub.f32 0.0, %v2960_v58  ;;  %v2966_v63 = vpop.f32.mrb[25].mxu0 }
 0x1fa   : > { %v2018_v32 = vpop.eup %2017  ;;  %v931_v0 = vadd.f32 1.0, %v2016_v56  ;;  %2037 = vpow2.f32 %v895_v49  ;;  %v1020_v35 = vmul.f32 %v988_v54, %v2893_v6  ;;  %v844_v2 = vsub.f32 0.0, %v2966_v63  ;;  %v2971_v43 = vpop.f32.mrb[20].mxu1 }
 0x1fb   : > { %v2020_v4 = vpop.eup %2019  ;;  %v932_v8 = vadd.f32 1.0, %v2018_v32  ;;  %2039 = vpow2.f32 %v897_v57  ;;  %v899_v10 = vmul.f32 1.442695, %v843_v62  ;;  %v1021_v11 = vmul.f32 %v989_v61, %v2902_v26  ;;  %v2976_v24 = vpop.f32.mrb[21].mxu1 }
 0x1fc   : > { %v2022_v16 = vpop.eup %2021  ;;  %v990_v17 = vmul.f32 %v2020_v4, %v2876_v47  ;;  %2041 = vrcp.f32 %v931_v0  ;;  %v901_v19 = vmul.f32 1.442695, %v844_v2  ;;  %1227 = vmatprep.mubr.f32.mxu0 %v1020_v35  ;;  %v2974_v22 = vpop.f32.mrb[26].mxu0 }
 0x1fd   : > { %v2024_v6 = vpop.eup %2023  ;;  %v991_v25 = vmul.f32 %v2022_v16, %v2881_v55  ;;  %2043 = vrcp.f32 %v932_v8  ;;  %1228 = vmatmul.mubr.f32.gmra.mrb[40].mxu0 %v1019_v50  ;;  %v845_v1 = vsub.f32 0.0, %v2974_v22  ;;  %v2980_v26 = vpop.f32.mrb[27].mxu0 }
 0x1fe   : > { %v2026_v44 = vpop.eup %2025  ;;  %v933_v28 = vadd.f32 1.0, %v2024_v6  ;;  %2045 = vpow2.f32 %v899_v10  ;;  %v1022_v47 = vmul.f32 %v990_v17, %v2907_v34  ;;  %v846_v20 = vsub.f32 0.0, %v2980_v26  ;;  %v2986_v40 = vpop.f32.mrb[22].mxu1 }
 0x1ff   : > { %v2028_v30 = vpop.eup %2027  ;;  %v992_v3 = vmul.f32 %v2026_v44, %v2886_v59  ;;  %2047 = vpow2.f32 %v901_v19  ;;  %v903_v18 = vmul.f32 1.442695, %v845_v1  ;;  %v1023_v55 = vmul.f32 %v991_v25, %v2916_v7  ;;  %v2990_v23 = vpop.f32.mrb[23].mxu1 }
 0x200   : > { %v2030_v41 = vpop.eup %2029  ;;  %2049 = vrcp.f32 %v933_v28  ;;  %v934_v51 = vadd.f32 1.0, %v2028_v30  ;;  %v905_v42 = vmul.f32 1.442695, %v846_v20  ;;  %1233 = vmatprep.mubr.f32.mxu0 %v1022_v47  ;;  %v2988_v45 = vpop.f32.mrb[28].mxu0 }
 0x201   : > { %v2032_v34 = vpop.eup %2031  ;;  %v935_v46 = vadd.f32 1.0, %v2030_v41  ;;  %2051 = vpow2.f32 %v903_v18  ;;  %v1024_v59 = vmul.f32 %v992_v3, %v2921_v53  ;;  %1234 = vmatmul.mubr.f32.gmra.mrb[42].mxu0 %v1021_v11  ;;  %v847_v48 = vsub.f32 0.0, %v2988_v45  ;;  %v2994_v7 = vpop.f32.mrb[29].mxu0 }
 0x202   : > { %v2034_v49 = vpop.eup %2033  ;;  %2053 = vrcp.f32 %v934_v51  ;;  %v936_v50 = vadd.f32 1.0, %v2032_v34  ;;  %v848_v31 = vsub.f32 0.0, %v2994_v7  ;;  %v2998_v61 = vpop.f32.mrb[24].mxu1 }
 0x203   : > { %v2036_v54 = vpop.eup %2035  ;;  %v993_v57 = vmul.f32 %v2034_v49, %v2891_v5  ;;  %2055 = vrcp.f32 %v935_v46  ;;  %v907_v56 = vmul.f32 1.442695, %v847_v48  ;;  %1239 = vmatprep.mubr.f32.mxu0 %v1024_v59  ;;  %v3003_v35 = vpop.f32.mrb[25].mxu1 }
 0x204   : > { %v2038_v62 = vpop.eup %2037  ;;  %v994_v53 = vmul.f32 %v2036_v54, %v2897_v12  ;;  %2057 = vrcp.f32 %v936_v50  ;;  %v909_v32 = vmul.f32 1.442695, %v848_v31  ;;  %v3001_v0 = vpop.f32.mrb[30].mxu0 }
 0x205   : > { %v2040_v2 = vpop.eup %2039  ;;  %v937_v4 = vadd.f32 1.0, %v2038_v62  ;;  %2059 = vpow2.f32 %v905_v42  ;;  %v1025_v8 = vmul.f32 %v993_v57, %v2930_v13  ;;  %1240 = vmatmul.mubr.f32.gmra.mrb[44].mxu0 %v1023_v55  ;;  %v849_v5 = vsub.f32 0.0, %v3001_v0  ;;  %v3007_v10 = vpop.f32.mrb[31].mxu0 }
 0x206   : > { %v2042_v11 = vpop.eup %2041  ;;  %v938_v16 = vadd.f32 1.0, %v2040_v2  ;;  %2061 = vpow2.f32 %v907_v56  ;;  %v1026_v12 = vmul.f32 %v994_v53, %v2935_v15  ;;  %v850_v17 = vsub.f32 0.0, %v3007_v10  ;;  %v3012_v1 = vpop.f32.mrb[26].mxu1 }
 0x207   : > { %v2044_v19 = vpop.eup %2043  ;;  %v995_v6 = vmul.f32 %v2042_v11, %v2905_v33  ;;  %2063 = vrcp.f32 %v937_v4  ;;  %v911_v25 = vmul.f32 1.442695, %v849_v5  ;;  %v3015_v28 = vpop.f32.mrb[27].mxu1 }
 0x208   : > { %v2046_v13 = vpop.eup %2045  ;;  %v996_v44 = vmul.f32 %v2044_v19, %v2911_v38  ;;  %2065 = vrcp.f32 %v938_v16  ;;  %1245 = vmatprep.mubr.f32.mxu0 %v1026_v12  ;;  %v913_v15 = vmul.f32 1.442695, %v850_v17  ;;  %v3020_v38 = vpop.f32.mrb[28].mxu1 }
 0x209   : > { %v2048_v47 = vpop.eup %2047  ;;  %v939_v20 = vadd.f32 1.0, %v2046_v13  ;;  %2067 = vpow2.f32 %v909_v32  ;;  %v1027_v30 = vmul.f32 %v995_v6, %v2943_v29  ;;  %1246 = vmatmul.mubr.f32.gmra.mrb[46].mxu0 %v1025_v8  ;;  %v3022_v34 = vpop.f32.mrb[29].mxu1 }
 0x20a   : > { %v2050_v3 = vpop.eup %2049  ;;  %v940_v33 = vadd.f32 1.0, %v2048_v47  ;;  %2069 = vpow2.f32 %v911_v25  ;;  %v1028_v18 = vmul.f32 %v996_v44, %v2948_v37  ;;  %v814_v31 = vpop.f32.mrb[30].mxu1 }
 0x20b   : > { %v2052_v55 = vpop.eup %2051  ;;  %v997_v41 = vmul.f32 %v2050_v3, %v2919_v9  ;;  %2071 = vrcp.f32 %v939_v20  ;;  %v816_v62 = vpop.f32.mrb[31].mxu1  ;;  %v1044_v3 = vld [vmem:[#allocation2 + $0x8] sm:$0xff] }
 0x20c   : > { %v2054_v51 = vpop.eup %2053  ;;  %2073 = vrcp.f32 %v940_v33  ;;  %v941_v42 = vadd.f32 1.0, %v2052_v55  ;;  %1251 = vmatprep.mubr.f32.mxu1 %v1028_v18 }
 0x20d   : > { %v2056_v46 = vpop.eup %2055  ;;  %v998_v29 = vmul.f32 %v2054_v51, %v2925_v27  ;;  %2075 = vpow2.f32 %v913_v15  ;;  %v1029_v59 = vmul.f32 %v997_v41, %v2957_v52  ;;  %1252 = vmatmul.mubr.f32.vlgmr.msra.gmra.mrb[32].mxu1 %v1027_v30  ;;  %v1045_v41 = vld [vmem:[#allocation2 + $0x10] sm:$0xff] }
 0x20e   : > { %v2058_v37 = vpop.eup %2057  ;;  %v999_v48 = vmul.f32 %v2056_v46, %v2933_v14  ;;  %2077 = vrcp.f32 %v941_v42  ;;  %v1048_v46 = vld [vmem:[#allocation2 + $0x28] sm:$0xff] }
 0x20f   : > { %v2060_v9 = vpop.eup %2059  ;;  %v1000_v49 = vmul.f32 %v2058_v37, %v2939_v39  ;;  %v1030_v50 = vmul.f32 %v998_v29, %v2962_v60 }
 0x210   : > { %v2062_v54 = vpop.eup %2061  ;;  %v942_v57 = vadd.f32 1.0, %v2060_v9  ;;  %v1031_v56 = vmul.f32 %v999_v48, %v2971_v43  ;;  %v1049_v9 = vld [vmem:[#allocation2 + $0x30] sm:$0xff] }
 0x211   : > { %v2064_v27 = vpop.eup %2063  ;;  %v943_v53 = vadd.f32 1.0, %v2062_v54  ;;  %v1032_v52 = vmul.f32 %v1000_v49, %v2976_v24  ;;  %1257 = vmatprep.mubr.f32.mxu1 %v1030_v50  ;;  %v1050_v49 = vld [vmem:[#allocation2 + $0x38] sm:$0xff] }
 0x212   : > { %v2066_v32 = vpop.eup %2065  ;;  %v1001_v14 = vmul.f32 %v2064_v27, %v2946_v36  ;;  %2079 = vrcp.f32 %v942_v57  ;;  %1258 = vmatmul.mubr.f32.gmra.mrb[34].mxu1 %v1029_v59 }
 0x213   : > { %v2068_v2 = vpop.eup %2067  ;;  %v1002_v39 = vmul.f32 %v2066_v32, %v2952_v21  ;;  %2081 = vrcp.f32 %v943_v53  ;;  %1263 = vmatprep.mubr.f32.mxu1 %v1032_v52 }
 0x214   : > { %v2070_v60 = vpop.eup %2069  ;;  %v944_v4 = vadd.f32 1.0, %v2068_v2  ;;  %v1033_v43 = vmul.f32 %v1001_v14, %v2986_v40  ;;  %v1053_v14 = vld [vmem:[#allocation2 + $0x50] sm:$0xff]  ;;  %v1054_v2 = vld [vmem:[#allocation2 + $0x58] sm:$0xff] }
 0x215   : > { %v2072_v8 = vpop.eup %2071  ;;  %v945_v5 = vadd.f32 1.0, %v2070_v60  ;;  %v1034_v11 = vmul.f32 %v1002_v39, %v2990_v23 }
 0x216   : > { %v2074_v24 = vpop.eup %2073  ;;  %v1003_v16 = vmul.f32 %v2072_v8, %v2960_v58  ;;  %2083 = vrcp.f32 %v944_v4  ;;  %1264 = vmatmul.mubr.f32.gmra.mrb[36].mxu1 %v1031_v56  ;;  %v1051_v56 = vld [vmem:[#allocation2 + $0x40] sm:$0xff] }
 0x217   : > { %v2076_v36 = vpop.eup %2075  ;;  %v1004_v12 = vmul.f32 %v2074_v24, %v2966_v63  ;;  %2085 = vrcp.f32 %v945_v5  ;;  %1269 = vmatprep.mubr.f32.mxu1 %v1034_v11  ;;  %v1055_v8 = vld [vmem:[#allocation2 + $0x60] sm:$0xff]  ;;  %v1056_v5 = vld [vmem:[#allocation2 + $0x68] sm:$0xff] }
 0x218   : > { %v2078_v21 = vpop.eup %2077  ;;  %v946_v17 = vadd.f32 1.0, %v2076_v36  ;;  %v1035_v19 = vmul.f32 %v1003_v16, %v2998_v61 }
 0x219   : > { %v1005_v40 = vmul.f32 %v2078_v21, %v2974_v22  ;;  %v1036_v6 = vmul.f32 %v1004_v12, %v3003_v35  ;;  %v1057_v12 = vld [vmem:[#allocation2 + $0x70] sm:$0xff]  ;;  %v1058_v21 = vld [vmem:[#allocation2 + $0x78] sm:$0xff] }
 0x21a   : > { %2087 = vrcp.f32 %v946_v17  ;;  %1270 = vmatmul.mubr.f32.gmra.mrb[38].mxu1 %v1033_v43 }
 0x21b   : > { %v1037_v23 = vmul.f32 %v1005_v40, %v3012_v1  ;;  %1275 = vmatprep.mubr.f32.mxu1 %v1036_v6 }
 0x21c   : > { %v2080_v58 = vpop.eup %2079 }
 0x21d   : > { %v2082_v25 = vpop.eup %2081  ;;  %v1006_v13 = vmul.f32 %v2080_v58, %v2980_v26  ;;  %v1060_v58 = vld [vmem:[#allocation2 + $0x88] sm:$0xff] }
 0x21e   : > { %v1007_v63 = vmul.f32 %v2082_v25, %v2988_v45  ;;  %1276 = vmatmul.mubr.f32.gmra.mrb[40].mxu1 %v1035_v19 }
 0x21f   : > { %v1038_v44 = vmul.f32 %v1006_v13, %v3015_v28  ;;  %v1043_v28 = vld [vmem:[#allocation2] sm:$0xff] }
 0x220   : > { %v2084_v47 = vpop.eup %2083  ;;  %v1039_v61 = vmul.f32 %v1007_v63, %v3020_v38 }
 0x221   : > { %v2086_v22 = vpop.eup %2085  ;;  %v1008_v35 = vmul.f32 %v2084_v47, %v2994_v7  ;;  %1281 = vmatprep.mubr.f32.mxu1 %v1038_v44  ;;  %v1061_v47 = vld [vmem:[#allocation2 + $0x90] sm:$0xff] }
 0x222   : > { %v1009_v20 = vmul.f32 %v2086_v22, %v3001_v0  ;;  %1282 = vmatmul.mubr.f32.gmra.mrb[42].mxu1 %v1037_v23  ;;  %v1046_v0 = vld [vmem:[#allocation2 + $0x18] sm:$0xff]  ;;  %v1059_v23 = vld [vmem:[#allocation2 + $0x80] sm:$0xff] }
 0x223   : > { %v1040_v1 = vmul.f32 %v1008_v35, %v3022_v34 }
 0x224   : > { %v2088_v15 = vpop.eup %2087  ;;  %v1041_v30 = vmul.f32 %v1009_v20, %v814_v31 }
 0x225   : > { %v1010_v26 = vmul.f32 %v2088_v15, %v3007_v10  ;;  %1287 = vmatprep.mubr.f32.mxu1 %v1040_v1  ;;  %v1047_v10 = vld [vmem:[#allocation2 + $0x20] sm:$0xff] }
 0x226   : > { %1288 = vmatmul.mubr.f32.gmra.mrb[44].mxu1 %v1039_v61  ;;  %v1062_v61 = vld [vmem:[#allocation2 + $0x98] sm:$0xff]  ;;  %v1063_v15 = vld [vmem:[#allocation2 + $0xa0] sm:$0xff] }
 0x227   : > { %v1042_v45 = vmul.f32 %v1010_v26, %v816_v62  ;;  %v1052_v62 = vld [vmem:[#allocation2 + $0x48] sm:$0xff] }
 0x229   : > { %1293 = vmatprep.mubr.f32.mxu1 %v1042_v45 }
 0x22a   : > { %1294 = vmatmul.mubr.f32.gmra.mrb[46].mxu1 %v1041_v30  ;;  %v1064_v30 = vld [vmem:[#allocation2 + $0xa8] sm:$0xff] }
 0x2be   : > { %v1205_v33 = vpop.f32.mrb[32].mxu0 }
 0x2bf   : > { %v1300_v18 = vadd.f32 %v1205_v33, %v1043_v28  ;;  %v1207_v7 = vpop.f32.mrb[33].mxu0  ;;  %v1065_v33 = vld [vmem:[#allocation2 + $0xb0] sm:$0xff] }
 0x2c0   : > { %v1301_v55 = vadd.f32 %v1207_v7, %v1044_v3 }
 0x2c1   : > { %1332 = vst [vmem:[#allocation2] sm:$0xff] %v1300_v18  ;;  %v1066_v18 = vld [vmem:[#allocation2 + $0xb8] sm:$0xff] }
 0x2c2   : > { %1333 = vst [vmem:[#allocation2 + $0x8] sm:$0xff] %v1301_v55  ;;  %v1211_v38 = vpop.f32.mrb[34].mxu0 }
 0x2c3   : > { %v1302_v51 = vadd.f32 %v1211_v38, %v1045_v41  ;;  %v1213_v42 = vpop.f32.mrb[35].mxu0  ;;  %v1067_v38 = vld [vmem:[#allocation2 + $0xc0] sm:$0xff] }
 0x2c4   : > { %v1303_v34 = vadd.f32 %v1213_v42, %v1046_v0 }
 0x2c5   : > { %1334 = vst [vmem:[#allocation2 + $0x10] sm:$0xff] %v1302_v51  ;;  %v1068_v51 = vld [vmem:[#allocation2 + $0xc8] sm:$0xff] }
 0x2c6   : > { %1335 = vst [vmem:[#allocation2 + $0x18] sm:$0xff] %v1303_v34  ;;  %v1217_v29 = vpop.f32.mrb[36].mxu0 }
 0x2c7   : > { %v1304_v59 = vadd.f32 %v1217_v29, %v1047_v10  ;;  %v1219_v37 = vpop.f32.mrb[37].mxu0  ;;  %v1069_v29 = vld [vmem:[#allocation2 + $0xd0] sm:$0xff] }
 0x2c8   : > { %v1305_v48 = vadd.f32 %v1219_v37, %v1048_v46 }
 0x2c9   : > { %1336 = vst [vmem:[#allocation2 + $0x20] sm:$0xff] %v1304_v59  ;;  %v1070_v59 = vld [vmem:[#allocation2 + $0xd8] sm:$0xff] }
 0x2ca   : > { %1337 = vst [vmem:[#allocation2 + $0x28] sm:$0xff] %v1305_v48 }
 0x2cc   : > { %v1223_v50 = vpop.f32.mrb[38].mxu0 }
 0x2cd   : > { %v1306_v31 = vadd.f32 %v1223_v50, %v1049_v9  ;;  %v1225_v54 = vpop.f32.mrb[39].mxu0  ;;  %v1071_v50 = vld [vmem:[#allocation2 + $0xe0] sm:$0xff] }
 0x2ce   : > { %v1307_v57 = vadd.f32 %v1225_v54, %v1050_v49 }
 0x2cf   : > { %1338 = vst [vmem:[#allocation2 + $0x30] sm:$0xff] %v1306_v31  ;;  %v1072_v31 = vld [vmem:[#allocation2 + $0xe8] sm:$0xff] }
 0x2d0   : > { %1339 = vst [vmem:[#allocation2 + $0x38] sm:$0xff] %v1307_v57  ;;  %v1229_v27 = vpop.f32.mrb[40].mxu0 }
 0x2d1   : > { %v1308_v53 = vadd.f32 %v1229_v27, %v1051_v56  ;;  %v1231_v52 = vpop.f32.mrb[41].mxu0  ;;  %v1073_v27 = vld [vmem:[#allocation2 + $0xf0] sm:$0xff] }
 0x2d2   : > { %v1309_v32 = vadd.f32 %v1231_v52, %v1052_v62 }
 0x2d3   : > { %1340 = vst [vmem:[#allocation2 + $0x40] sm:$0xff] %v1308_v53  ;;  %v1074_v53 = vld [vmem:[#allocation2 + $0xf8] sm:$0xff] }
 0x2d4   : > { %1341 = vst [vmem:[#allocation2 + $0x48] sm:$0xff] %v1309_v32  ;;  %v1235_v39 = vpop.f32.mrb[42].mxu0 }
 0x2d5   : > { %v1310_v60 = vadd.f32 %v1235_v39, %v1053_v14  ;;  %v1237_v4 = vpop.f32.mrb[43].mxu0  ;;  %v1368_v39 = vld [vmem:[#allocation2] sm:$0xff] (!%p1607_p8) }
 0x2d6   : > { %v1311_v43 = vadd.f32 %v1237_v4, %v1054_v2  ;;  %v1370_v4 = vld [vmem:[#allocation2 + $0x10] sm:$0xff] (!%p1607_p8)  ;;  %1400 = vst [vmem:[%s2604_s7] sm:$0xff] (!%p1607_p8), %v1368_v39 }
 0x2d7   : > { %1342 = vst [vmem:[#allocation2 + $0x50] sm:$0xff] %v1310_v60  ;;  %v1369_v60 = vld [vmem:[#allocation2 + $0x8] sm:$0xff] (!%p1607_p8)  ;;  %1402 = vst [vmem:[%s2604_s7 + $0x10] sm:$0xff] (!%p1607_p8), %v1370_v4 }
 0x2d8   : > { %1343 = vst [vmem:[#allocation2 + $0x58] sm:$0xff] %v1311_v43  ;;  %v1241_v11 = vpop.f32.mrb[44].mxu0  ;;  %1401 = vst [vmem:[%s2604_s7 + $0x8] sm:$0xff] (!%p1607_p8), %v1369_v60  ;;  %v1371_v43 = vld [vmem:[#allocation2 + $0x18] sm:$0xff] (!%p1607_p8) }
 0x2d9   : > { %v1312_v24 = vadd.f32 %v1241_v11, %v1055_v8  ;;  %v1243_v16 = vpop.f32.mrb[45].mxu0  ;;  %v1372_v8 = vld [vmem:[#allocation2 + $0x20] sm:$0xff] (!%p1607_p8)  ;;  %1403 = vst [vmem:[%s2604_s7 + $0x18] sm:$0xff] (!%p1607_p8), %v1371_v43  ;;  %v1374_v11 = vld [vmem:[#allocation2 + $0x30] sm:$0xff] (!%p1607_p8) }
 0x2da   : > { %v1313_v36 = vadd.f32 %v1243_v16, %v1056_v5  ;;  %v1373_v5 = vld [vmem:[#allocation2 + $0x28] sm:$0xff] (!%p1607_p8)  ;;  %1404 = vst [vmem:[%s2604_s7 + $0x20] sm:$0xff] (!%p1607_p8), %v1372_v8  ;;  %v1376_v16 = vld [vmem:[#allocation2 + $0x40] sm:$0xff] (!%p1607_p8)  ;;  %1406 = vst [vmem:[%s2604_s7 + $0x30] sm:$0xff] (!%p1607_p8), %v1374_v11 }
 0x2db   : > { %1344 = vst [vmem:[#allocation2 + $0x60] sm:$0xff] %v1312_v24  ;;  %1405 = vst [vmem:[%s2604_s7 + $0x28] sm:$0xff] (!%p1607_p8), %v1373_v5  ;;  %v1375_v24 = vld [vmem:[#allocation2 + $0x38] sm:$0xff] (!%p1607_p8) }
 0x2dc   : > { %1345 = vst [vmem:[#allocation2 + $0x68] sm:$0xff] %v1313_v36  ;;  %v1247_v17 = vpop.f32.mrb[46].mxu0  ;;  %1407 = vst [vmem:[%s2604_s7 + $0x38] sm:$0xff] (!%p1607_p8), %v1375_v24  ;;  %v1377_v36 = vld [vmem:[#allocation2 + $0x48] sm:$0xff] (!%p1607_p8) }
 0x2dd   : > { %v1314_v19 = vadd.f32 %v1247_v17, %v1057_v12  ;;  %v1249_v40 = vpop.f32.mrb[47].mxu0  ;;  %1408 = vst [vmem:[%s2604_s7 + $0x40] sm:$0xff] (!%p1607_p8), %v1376_v16  ;;  %1409 = vst [vmem:[%s2604_s7 + $0x48] sm:$0xff] (!%p1607_p8), %v1377_v36 }
 0x2de   : > { %v1315_v6 = vadd.f32 %v1249_v40, %v1058_v21  ;;  %v1378_v12 = vld [vmem:[#allocation2 + $0x50] sm:$0xff] (!%p1607_p8) }
 0x2df   : > { %1346 = vst [vmem:[#allocation2 + $0x70] sm:$0xff] %v1314_v19  ;;  %v1379_v21 = vld [vmem:[#allocation2 + $0x58] sm:$0xff] (!%p1607_p8)  ;;  %1410 = vst [vmem:[%s2604_s7 + $0x50] sm:$0xff] (!%p1607_p8), %v1378_v12 }
 0x2e0   : > { %1347 = vst [vmem:[#allocation2 + $0x78] sm:$0xff] %v1315_v6  ;;  %v1253_v25 = vpop.f32.mrb[32].mxu1  ;;  %1411 = vst [vmem:[%s2604_s7 + $0x58] sm:$0xff] (!%p1607_p8), %v1379_v21 }
 0x2e1   : > { %v1316_v13 = vadd.f32 %v1253_v25, %v1059_v23  ;;  %v1255_v63 = vpop.f32.mrb[33].mxu1 }
 0x2e2   : > { %v1317_v44 = vadd.f32 %v1255_v63, %v1060_v58  ;;  %v1380_v17 = vld [vmem:[#allocation2 + $0x60] sm:$0xff] (!%p1607_p8) }
 0x2e3   : > { %1348 = vst [vmem:[#allocation2 + $0x80] sm:$0xff] %v1316_v13  ;;  %v1381_v19 = vld [vmem:[#allocation2 + $0x68] sm:$0xff] (!%p1607_p8)  ;;  %1412 = vst [vmem:[%s2604_s7 + $0x60] sm:$0xff] (!%p1607_p8), %v1380_v17 }
 0x2e4   : > { %1349 = vst [vmem:[#allocation2 + $0x88] sm:$0xff] %v1317_v44  ;;  %1413 = vst [vmem:[%s2604_s7 + $0x68] sm:$0xff] (!%p1607_p8), %v1381_v19 }
 0x2e5   : > { %v1259_v22 = vpop.f32.mrb[34].mxu1 }
 0x2e6   : > { %v1318_v35 = vadd.f32 %v1259_v22, %v1061_v47  ;;  %v1261_v20 = vpop.f32.mrb[35].mxu1  ;;  %v1382_v40 = vld [vmem:[#allocation2 + $0x70] sm:$0xff] (!%p1607_p8) }
 0x2e7   : > { %v1319_v1 = vadd.f32 %v1261_v20, %v1062_v61  ;;  %1414 = vst [vmem:[%s2604_s7 + $0x70] sm:$0xff] (!%p1607_p8), %v1382_v40  ;;  %v1383_v6 = vld [vmem:[#allocation2 + $0x78] sm:$0xff] (!%p1607_p8) }
 0x2e8   : > { %1350 = vst [vmem:[#allocation2 + $0x90] sm:$0xff] %v1318_v35  ;;  %1415 = vst [vmem:[%s2604_s7 + $0x78] sm:$0xff] (!%p1607_p8), %v1383_v6 }
 0x2e9   : > { %1351 = vst [vmem:[#allocation2 + $0x98] sm:$0xff] %v1319_v1  ;;  %v1265_v26 = vpop.f32.mrb[36].mxu1 }
 0x2ea   : > { %v1320_v45 = vadd.f32 %v1265_v26, %v1063_v15  ;;  %v1267_v28 = vpop.f32.mrb[37].mxu1  ;;  %v1384_v23 = vld [vmem:[#allocation2 + $0x80] sm:$0xff] (!%p1607_p8) }
 0x2eb   : > { %v1321_v3 = vadd.f32 %v1267_v28, %v1064_v30  ;;  %v1385_v58 = vld [vmem:[#allocation2 + $0x88] sm:$0xff] (!%p1607_p8)  ;;  %1416 = vst [vmem:[%s2604_s7 + $0x80] sm:$0xff] (!%p1607_p8), %v1384_v23 }
 0x2ec   : > { %1352 = vst [vmem:[#allocation2 + $0xa0] sm:$0xff] %v1320_v45  ;;  %1417 = vst [vmem:[%s2604_s7 + $0x88] sm:$0xff] (!%p1607_p8), %v1385_v58 }
 0x2ed   : > { %1353 = vst [vmem:[#allocation2 + $0xa8] sm:$0xff] %v1321_v3  ;;  %v1271_v7 = vpop.f32.mrb[38].mxu1 }
 0x2ee   : > { %v1322_v55 = vadd.f32 %v1271_v7, %v1065_v33  ;;  %v1273_v41 = vpop.f32.mrb[39].mxu1 }
 0x2ef   : > { %v1323_v0 = vadd.f32 %v1273_v41, %v1066_v18  ;;  %v1386_v25 = vld [vmem:[#allocation2 + $0x90] sm:$0xff] (!%p1607_p8) }
 0x2f0   : > { %1354 = vst [vmem:[#allocation2 + $0xb0] sm:$0xff] %v1322_v55  ;;  %v1387_v13 = vld [vmem:[#allocation2 + $0x98] sm:$0xff] (!%p1607_p8)  ;;  %1418 = vst [vmem:[%s2604_s7 + $0x90] sm:$0xff] (!%p1607_p8), %v1386_v25 }
 0x2f1   : > { %1355 = vst [vmem:[#allocation2 + $0xb8] sm:$0xff] %v1323_v0  ;;  %v1277_v42 = vpop.f32.mrb[40].mxu1  ;;  %1419 = vst [vmem:[%s2604_s7 + $0x98] sm:$0xff] (!%p1607_p8), %v1387_v13 }
 0x2f2   : > { %v1324_v34 = vadd.f32 %v1277_v42, %v1067_v38  ;;  %v1279_v10 = vpop.f32.mrb[41].mxu1 }
 0x2f3   : > { %v1325_v46 = vadd.f32 %v1279_v10, %v1068_v51  ;;  %v1388_v63 = vld [vmem:[#allocation2 + $0xa0] sm:$0xff] (!%p1607_p8) }
 0x2f4   : > { %1356 = vst [vmem:[#allocation2 + $0xc0] sm:$0xff] %v1324_v34  ;;  %1420 = vst [vmem:[%s2604_s7 + $0xa0] sm:$0xff] (!%p1607_p8), %v1388_v63  ;;  %v1389_v44 = vld [vmem:[#allocation2 + $0xa8] sm:$0xff] (!%p1607_p8) }
 0x2f5   : > { %1357 = vst [vmem:[#allocation2 + $0xc8] sm:$0xff] %v1325_v46  ;;  %v1283_v37 = vpop.f32.mrb[42].mxu1  ;;  %1421 = vst [vmem:[%s2604_s7 + $0xa8] sm:$0xff] (!%p1607_p8), %v1389_v44 }
 0x2f6   : > { %v1326_v48 = vadd.f32 %v1283_v37, %v1069_v29  ;;  %v1285_v9 = vpop.f32.mrb[43].mxu1 }
 0x2f7   : > { %v1327_v49 = vadd.f32 %v1285_v9, %v1070_v59  ;;  %v1390_v47 = vld [vmem:[#allocation2 + $0xb0] sm:$0xff] (!%p1607_p8) }
 0x2f8   : > { %1358 = vst [vmem:[#allocation2 + $0xd0] sm:$0xff] %v1326_v48  ;;  %v1391_v61 = vld [vmem:[#allocation2 + $0xb8] sm:$0xff] (!%p1607_p8)  ;;  %1422 = vst [vmem:[%s2604_s7 + $0xb0] sm:$0xff] (!%p1607_p8), %v1390_v47 }
 0x2f9   : > { %1359 = vst [vmem:[#allocation2 + $0xd8] sm:$0xff] %v1327_v49  ;;  %v1289_v54 = vpop.f32.mrb[44].mxu1  ;;  %1423 = vst [vmem:[%s2604_s7 + $0xb8] sm:$0xff] (!%p1607_p8), %v1391_v61 }
 0x2fa   : > { %v1328_v57 = vadd.f32 %v1289_v54, %v1071_v50  ;;  %v1291_v56 = vpop.f32.mrb[45].mxu1 }
 0x2fb   : > { %v1329_v62 = vadd.f32 %v1291_v56, %v1072_v31  ;;  %1367 = sbr.rel (%p1607_p8) target bundleno = 778 (0x30a), region = 52  ;;  %v1392_v22 = vld [vmem:[#allocation2 + $0xc0] sm:$0xff] (!%p1607_p8) }
 0x2fc   : > { %1360 = vst [vmem:[#allocation2 + $0xe0] sm:$0xff] %v1328_v57  ;;  %v1393_v35 = vld [vmem:[#allocation2 + $0xc8] sm:$0xff] (!%p1607_p8)  ;;  %1424 = vst [vmem:[%s2604_s7 + $0xc0] sm:$0xff] (!%p1607_p8), %v1392_v22 }
 0x2fd   : > { %1361 = vst [vmem:[#allocation2 + $0xe8] sm:$0xff] %v1329_v62  ;;  %v1295_v52 = vpop.f32.mrb[46].mxu1  ;;  %1425 = vst [vmem:[%s2604_s7 + $0xc8] sm:$0xff] (!%p1607_p8), %v1393_v35 }
 0x2fe   : > { %v1330_v32 = vadd.f32 %v1295_v52, %v1073_v27  ;;  %v1297_v14 = vpop.f32.mrb[47].mxu1 }
 0x2ff   : > { %v1331_v2 = vadd.f32 %v1297_v14, %v1074_v53  ;;  %v1394_v20 = vld [vmem:[#allocation2 + $0xd0] sm:$0xff] (!%p1607_p8) }
 0x300   : > { %1362 = vst [vmem:[#allocation2 + $0xf0] sm:$0xff] %v1330_v32  ;;  %1426 = vst [vmem:[%s2604_s7 + $0xd0] sm:$0xff] (!%p1607_p8), %v1394_v20  ;;  %v1395_v1 = vld [vmem:[#allocation2 + $0xd8] sm:$0xff] (!%p1607_p8) }
 0x301   : > { %1363 = vst [vmem:[#allocation2 + $0xf8] sm:$0xff] %v1331_v2  ;;  %1427 = vst [vmem:[%s2604_s7 + $0xd8] sm:$0xff] (!%p1607_p8), %v1395_v1 }
 0x303   : > { %v1396_v15 = vld [vmem:[#allocation2 + $0xe0] sm:$0xff] }
 0x304   : > { %v1397_v30 = vld [vmem:[#allocation2 + $0xe8] sm:$0xff]  ;;  %1428 = vst [vmem:[%s2604_s7 + $0xe0] sm:$0xff] %v1396_v15 }
 0x305   : > { %1429 = vst [vmem:[%s2604_s7 + $0xe8] sm:$0xff] %v1397_v30 }
 0x307   : > { %v1398_v26 = vld [vmem:[#allocation2 + $0xf0] sm:$0xff] }
 0x308   : > { %v1399_v45 = vld [vmem:[#allocation2 + $0xf8] sm:$0xff]  ;;  %1430 = vst [vmem:[%s2604_s7 + $0xf0] sm:$0xff] %v1398_v26 }
 0x309   : > { %1431 = vst [vmem:[%s2604_s7 + $0xf8] sm:$0xff] %v1399_v45 }
 0x30a PF: > { %s1433_s18 = scalar_lea.sflag [#allocation5], %s2584_s21  ;;  %p3192_p4 = scmp.ne.s32.totalorder %s3186_s10, 0 }
 0x30b   : > { %s1609_s23 = sshll.u32 (%p3192_p4), %s2287_s19, 4 }
 0x30c   : > { %1439 = sbr.rel (!%p3192_p4) target bundleno = 815 (0x32f), region = 56  ;;  %s1441_s4 = ssub.s32 (%p3192_p4), 38, %s1609_s23 }
 0x30d   : > { %p1442_p13 = scmp.lt.s32.totalorder (%p3192_p4), %s1441_s4, 16 }
 0x313   : > { %s3217_s4 = smov (!%p1442_p13, %s1441_s4), 16 }
 0x314   : > { %s3086_s9 = sshll.u32 %s3217_s4, 8 }
 0x315   : > { %s1447_s28 = ssub.s32 4096, %s3086_s9 }
 0x316   : > { %1448 = vsyncadd %s1433_s18, %s1447_s28  ;;  %p1612_p3 = scmp.ne.s32.totalorder %s3086_s9, 0  ;;  %s1627_s10 = sshll.u32 %s2287_s19, 12 }
 0x317   : > { %s3096_s29 = scalar_lea.hbm %s3167_s3, %s1627_s10  ;;  %s1454_s5 = sshll.u32 %s2604_s7, 4  ;;  %s3099_s5 = int_to_ptr.vmem [resolvable:$true] %s1454_s5 }
 0x318   : > { %s2173_s6 = scalar_lea.vmem %s3099_s5, %s3086_s9  ;;  %s2312_s30 = smov [#allocation9]  }
 0x319   : > { %p2174_p11 = scmp.ne.s32.totalorder %s3099_s5, %s2173_s6  ;;  %s2177_s0 = sshll.u32 %s2312_s30, 4  ;;  %s2178_s0 = int_to_ptr.vmem [resolvable:$false] %s2177_s0 }
 0x31a   : > { %s2179_s19 = scalar_lea.vmem %s2178_s0, 8192  ;;  %p2180_p6 = scmp.lt.s32.totalorder %s3099_s5, %s2178_s0 }
 0x31b   : > { %p2175_p10 = pnand %p2174_p11, %p1612_p3  ;;  %p2181_p9 = scmp.lt.s32.totalorder %s2179_s19, %s2173_s6 }
 0x31d   : > { %p2176_p2 = pneg %p2175_p10  ;;  %p2182_p1 = por %p2181_p9, %p2180_p6 }
 0x31f   : > { %p2183_p0 = pnand %p2182_p1, %p2176_p2 }
 0x321   : > { %2186 = shalt.err (!%p2183_p0)
}
 0x322   : > { %s2187_s8 = scalar_lea.hbm %s3096_s29, %s3086_s9  ;;  %s2191_s12 = scalar_lea.hbm %s3167_s3, 9728 }
 0x323   : > { %p2188_p5 = scmp.ne.s32.totalorder %s3096_s29, %s2187_s8  ;;  %p2192_p8 = scmp.lt.u32.totalorder %s3096_s29, %s3167_s3 }
 0x324   : > { %p2193_p4 = scmp.lt.u32.totalorder %s2191_s12, %s2187_s8  ;;  %p2195_p11 = scmp.lt.u32.totalorder %s2187_s8, %s3096_s29 }
 0x325   : > { %p2189_p12 = pnand %p2188_p5, %p1612_p3 }
 0x326   : > { %p2194_p13 = por %p2193_p4, %p2192_p8 }
 0x327   : > { %p2190_p7 = pneg %p2189_p12 }
 0x328   : > { %p2196_p10 = por %p2195_p11, %p2194_p13 }
 0x32a   : > { %p2197_p2 = pnand %p2196_p10, %p2190_p7 }
 0x32c   : > { %2200 = shalt.err (!%p2197_p2)
}
 0x32d   : > { %s2313_s7 = smov 256   ;;  %s2314_s23 = smov 16  }
 0x32e   : > { %1460 = dma.vmem_to_hbm [thread:$0]  (%p1612_p3), %s3099_s5, %s3086_s9, %s3096_s29, %s1433_s18, %s2313_s7, %s2313_s7, %s2314_s23  }
 0x32f PF: > { %p1862_p6 = scmp.ge.s32.totalorder %s2299_s22, 2  ;;  %s1469_s4 = sand.u32 1, %s2271_s15  }
 0x330   : > { %p3193_p9 = scmp.ne.s32.totalorder %s3188_s11, 0  ;;  %s1470_s28 = scalar_lea.sflag [#allocation5], %s1469_s4 }
 0x332   : > { %p1859_p1 = pnand %p1862_p6, %p3193_p9 }
 0x334   : > { %2254 = dma.done.wait (!%p1859_p1), %s1470_s28, 4096  }
 0x335   : > { %2256 = vsyncadd (!%p1859_p1), %s1470_s28, 4294963200  ;;  %s22_s22 = sadd.s32 1, %s2299_s22   ;;  %s3194_s10 = sld [smem:[#allocation17_spill]] }
 0x336   : > { %p19_p0 = scmp.ge.s32.totalorder %s22_s22, 8   ;;  %s3195_s21 = sld [smem:[#allocation13_spill]] }
 0x337   : > { %s3196_s17 = sld [smem:[#allocation18_spill]]  ;;  %s3197_s19 = sld [smem:[#allocation14_spill]] }
 0x338   : > { %s3198_s9 = sld [smem:[#allocation15_spill]]  ;;  %s3199_s1 = sld [smem:[#allocation16_spill]] }
 0x339   : > { %s3200_s12 = smov %s2263_s13  ;;  %s3201_s13 = smov %s2267_s14 }
 0x33a   : > { %s3203_s15 = smov %s2275_s16  ;;  %s3205_s18 = smov %s2291_s20 }
 0x33b   : > { %s3202_s14 = smov %s3194_s10  ;;  %21 = sbr.rel (!%p19_p0) target bundleno = 14 (0xe), region = 109 }
 0x33c   : > { %s3204_s16 = smov %s3195_s21 }
 0x33e   : > { %s3206_s20 = smov %s3198_s9  ;;  %s3207_s21 = smov %s3199_s1 }
 0x342   :  { %1475 = vsyncpa [#allocation4], 1 }
 0x343   :  { %1477 = vsyncpa [#allocation4 + $0x1], 1 }
 0x344   :  { %1478 = vsyncpa [#allocation7], 1 }
 0x345   :  { %1480 = vsyncpa [#allocation7 + $0x1], 1 }
 0x346   :  { %1481 = vsyncpa [#allocation5], 1 }
 0x347   :  { %1483 = vsyncpa [#allocation5 + $0x1], 1 }

</bundles_post_ra>
